<compile_context>
chip_gen: v7x
topology: tpu7x:2x2x1
jax: 0.10.0
libtpu: 0.0.40
codegen_flags: <defaults>
</compile_context>

<pallas_src>
import math
from functools import partial

import jax
import jax.numpy as jnp
from jax.experimental import pallas as pl
from jax.experimental.pallas import tpu as pltpu

EPS = 1e-5


# ---------------------------------------------------------------------------
# Fused DownSample kernel
# ---------------------------------------------------------------------------
def _downsample_kernel(x_ref, r_ref, w_ref, wk_ref, o_ref, *, eps, mm_dtype):
    # x_ref, r_ref : (TI, 2, half, 2C)   dims = (i2-tile, ki, j2, kj*C + c)
    # w_ref        : (1, C)              RMSNorm weight
    # wk_ref       : (2, 2, C, Cout)     conv weight permuted to [ki, kj, ci, co]
    # o_ref        : (TI*half, Cout)     rows ordered (i2, j2) row-major
    ti, _, half, c2 = x_ref.shape
    c = c2 // 2
    m = ti * half

    s = x_ref[...] + r_ref[...]                       # residual add, (TI,2,half,2C)
    w = w_ref[...]                                    # (1, C)

    def rms(sh):                                      # sh: (TI, 2, half, C)
        ms = jnp.mean(sh * sh, axis=-1, keepdims=True)
        return sh * jax.lax.rsqrt(ms + eps) * w

    # Each spatial position's C channels live in one 128-aligned lane half.
    y0 = rms(s[..., :c])                              # columns with kj == 0
    y1 = rms(s[..., c:])                              # columns with kj == 1

    def mm(y, ki, kj):
        lhs = y[:, ki].reshape(m, c).astype(mm_dtype)     # (TI*half, C)
        rhs = wk_ref[ki, kj].astype(mm_dtype)             # (C, Cout)
        return jnp.dot(lhs, rhs, preferred_element_type=jnp.float32)

    # out[i2, j2, co] = sum_{ki,kj,ci} y[2i2+ki, 2j2+kj, ci] * W[co, ci, kj, ki]
    acc = mm(y0, 0, 0) + mm(y1, 0, 1) + mm(y0, 1, 0) + mm(y1, 1, 1)
    o_ref[...] = acc.astype(o_ref.dtype)


def downsample(x, res, norm_w, conv_w, *, eps=EPS, row_tile=None,
               mm_dtype=jnp.float32):
    """Fused DownSample.

    x, res : (B, S, C) float32, S = side*side with side even
    norm_w : (C,)                       RMSNorm weight
    conv_w : (2C, C, 2, 2) float32      torch Conv2d weight (O, I, kH, kW), no bias
    returns ((B, S//4, 2C) float32, None)   -- matches the PyTorch module
    """
    B, S, C = x.shape
    side = math.isqrt(S)
    assert side * side == S and side % 2 == 0, "seq len must be an even square"
    half = side // 2
    Cout = conv_w.shape[0]

    # Free row-major reshapes (NO data movement / HBM transpose):
    #   (B, S, C) -> (B, half, 2, half, 2C)  with dims (b, i2, ki, j2, kj*C + c)
    x5 = x.reshape(B, half, 2, half, 2 * C)
    r5 = res.reshape(B, half, 2, half, 2 * C)
    # Conv weight (co, ci, kh, kw) -> (ki=kw, kj=kh, ci, co); weights-only, done once.
    wk = jnp.transpose(conv_w, (3, 2, 1, 0))
    wn = norm_w.reshape(1, C)

    # Row tile over i2: largest divisor of `half` keeping each input block
    # ~<= 2 MiB, so 2 inputs x 2 pipeline buffers stay well inside VMEM on v7x.
    if row_tile is None:
        row_bytes = 2 * half * 2 * C * 4
        row_tile = max(1, min(half, (2 * 1024 * 1024) // max(row_bytes, 1)))
        while half % row_tile:
            row_tile -= 1
    if (row_tile * half) % 8 and row_tile != half:
        row_tile = half                      # keep output block sublane-aligned
    grid = (B, half // row_tile)

    out = pl.pallas_call(
        partial(_downsample_kernel, eps=eps, mm_dtype=mm_dtype),
        out_shape=jax.ShapeDtypeStruct((B, S // 4, Cout), jnp.float32),
        grid=grid,
        in_specs=[
            pl.BlockSpec((None, row_tile, 2, half, 2 * C),
                         lambda b, r: (b, r, 0, 0, 0)),
            pl.BlockSpec((None, row_tile, 2, half, 2 * C),
                         lambda b, r: (b, r, 0, 0, 0)),
            pl.BlockSpec((1, C), lambda b, r: (0, 0)),
            pl.BlockSpec((2, 2, C, Cout), lambda b, r: (0, 0, 0, 0)),
        ],
        out_specs=pl.BlockSpec((None, row_tile * half, Cout),
                               lambda b, r: (b, r, 0)),
        compiler_params=pltpu.CompilerParams(
            dimension_semantics=("parallel", "parallel")),
    )(x5, r5, wn, wk)
    return out, None


# ---------------------------------------------------------------------------
# Pure-JAX reference mirroring the PyTorch module (for correctness check)
# ---------------------------------------------------------------------------
def downsample_ref(x, res, norm_w, conv_w, eps=EPS):
    b, s, c = x.shape
    h = x + res
    y = h * jax.lax.rsqrt(jnp.mean(h * h, axis=-1, keepdims=True) + eps) * norm_w
    side = math.isqrt(s)
    yg = y.reshape(b, side, side, c)                     # (b, i, j, c)
    inp = jnp.transpose(yg, (0, 3, 2, 1))                # .transpose(1,3) -> (b, c, j, i)
    out = jax.lax.conv_general_dilated(
        inp, conv_w, window_strides=(2, 2), padding="VALID",
        dimension_numbers=("NCHW", "OIHW", "NCHW"),
        precision=jax.lax.Precision.HIGHEST)
    out = jnp.transpose(out, (0, 3, 2, 1))               # -> (b, i2, j2, co)
    return out.reshape(b, s // 4, 2 * c)


# TODO(synk): inference_params is accepted but unused by the PyTorch forward;
# it is simply omitted here.

if __name__ == "__main__":
    key = jax.random.PRNGKey(0)
    k1, k2, k3, k4 = jax.random.split(key, 4)

    B, side, C = 2, 16, 128                 # seq = 256, channels = 128 (lane-dense)
    S = side * side
    Cout = 2 * C

    x = jax.random.normal(k1, (B, S, C), dtype=jnp.float32)
    res = jax.random.normal(k2, (B, S, C), dtype=jnp.float32)
    norm_w = 1.0 + 0.02 * jax.random.normal(k3, (C,), dtype=jnp.float32)
    conv_w = 0.02 * jax.random.normal(k4, (Cout, C, 2, 2), dtype=jnp.float32)

    # f32-operand path (closest to PyTorch numerics)
    fwd = jax.jit(lambda a, b, w, cw: downsample(a, b, w, cw)[0])
    out = jax.block_until_ready(fwd(x, res, norm_w, conv_w))

    # bf16 MXU-operand path (v6e/v7x throughput option), f32 accumulation
    fwd_bf16 = jax.jit(
        lambda a, b, w, cw: downsample(a, b, w, cw, mm_dtype=jnp.bfloat16)[0])
    out_bf16 = jax.block_until_ready(fwd_bf16(x, res, norm_w, conv_w))

    ref = downsample_ref(x, res, norm_w, conv_w)

    assert out.shape == (B, S // 4, Cout), out.shape
    assert bool(jnp.all(jnp.isfinite(out)))
    err = float(jnp.max(jnp.abs(out - ref)))
    assert err < 5e-2, f"f32 path max abs err {err}"
    err_bf = float(jnp.max(jnp.abs(out_bf16.astype(jnp.float32) - ref)))
    assert err_bf < 1.5e-1, f"bf16 path max abs err {err_bf}"

    print("KERNEL_OK")
</pallas_src>

<mosaic_0001>
module attributes {stable_mosaic.version = 11 : i64} {
  func.func @_downsample_kernel(%arg0: i32, %arg1: i32, %arg2: memref<1x8x2x8x256xf32, #tpu.memory_space<vmem>>, %arg3: memref<1x8x2x8x256xf32, #tpu.memory_space<vmem>>, %arg4: memref<1x128xf32, #tpu.memory_space<vmem>>, %arg5: memref<2x2x128x256xf32, #tpu.memory_space<vmem>>, %arg6: memref<1x64x256xf32, #tpu.memory_space<vmem>>) attributes {dimension_semantics = [#tpu.dimension_semantics<parallel>, #tpu.dimension_semantics<parallel>], iteration_bounds = array<i64: 2, 1>, scalar_prefetch = 0 : i64, scratch_operands = 0 : i64, tpu.core_type = #tpu.core_type<tc>, window_params = [{transform_indices = @transform_0, window_bounds = array<i64: 1, 8, 2, 8, 256>}, {transform_indices = @transform_1, window_bounds = array<i64: 1, 8, 2, 8, 256>}, {pipeline_mode = #tpu.pipeline_mode<synchronous>, transform_indices = @transform_2, window_bounds = array<i64: 1, 128>}, {pipeline_mode = #tpu.pipeline_mode<synchronous>, transform_indices = @transform_3, window_bounds = array<i64: 2, 2, 128, 256>}, {transform_indices = @transform_4, window_bounds = array<i64: 1, 64, 256>}]} {
    %c0 = arith.constant 0 : index
    %c0_0 = arith.constant 0 : index
    %c0_1 = arith.constant 0 : index
    %c0_2 = arith.constant 0 : index
    %c0_3 = arith.constant 0 : index
    %0 = vector.load %arg2[%c0, %c0_0, %c0_1, %c0_2, %c0_3] : memref<1x8x2x8x256xf32, #tpu.memory_space<vmem>>, vector<1x8x2x8x256xf32>
    %1 = vector.shape_cast %0 : vector<1x8x2x8x256xf32> to vector<8x2x8x256xf32>
    %c0_4 = arith.constant 0 : index
    %c0_5 = arith.constant 0 : index
    %c0_6 = arith.constant 0 : index
    %c0_7 = arith.constant 0 : index
    %c0_8 = arith.constant 0 : index
    %2 = vector.load %arg3[%c0_4, %c0_5, %c0_6, %c0_7, %c0_8] : memref<1x8x2x8x256xf32, #tpu.memory_space<vmem>>, vector<1x8x2x8x256xf32>
    %3 = vector.shape_cast %2 : vector<1x8x2x8x256xf32> to vector<8x2x8x256xf32>
    %4 = arith.addf %1, %3 : vector<8x2x8x256xf32>
    %c0_9 = arith.constant 0 : index
    %c0_10 = arith.constant 0 : index
    %5 = vector.load %arg4[%c0_9, %c0_10] : memref<1x128xf32, #tpu.memory_space<vmem>>, vector<1x128xf32>
    %6 = vector.extract_strided_slice %4 {offsets = [0, 0, 0, 0], sizes = [8, 2, 8, 128], strides = [1, 1, 1, 1]} : vector<8x2x8x256xf32> to vector<8x2x8x128xf32>
    %7 = arith.mulf %6, %6 : vector<8x2x8x128xf32>
    %cst = arith.constant dense<0.000000e+00> : vector<8x2x8xf32>
    %8 = vector.multi_reduction <add>, %7, %cst [3] : vector<8x2x8x128xf32> to vector<8x2x8xf32>
    %9 = vector.shape_cast %8 : vector<8x2x8xf32> to vector<8x2x8x1xf32>
    %cst_11 = arith.constant 1.280000e+02 : f32
    %10 = vector.broadcast %cst_11 : f32 to vector<8x2x8x1xf32>
    %11 = arith.divf %9, %10 : vector<8x2x8x1xf32>
    %cst_12 = arith.constant 9.99999974E-6 : f32
    %12 = vector.broadcast %cst_12 : f32 to vector<8x2x8x1xf32>
    %13 = arith.addf %11, %12 : vector<8x2x8x1xf32>
    %14 = math.rsqrt %13 : vector<8x2x8x1xf32>
    %15 = vector.broadcast %14 : vector<8x2x8x1xf32> to vector<8x2x8x128xf32>
    %16 = arith.mulf %6, %15 : vector<8x2x8x128xf32>
    %17 = vector.shape_cast %5 : vector<1x128xf32> to vector<1x1x1x128xf32>
    %18 = vector.broadcast %17 : vector<1x1x1x128xf32> to vector<8x2x8x128xf32>
    %19 = arith.mulf %16, %18 : vector<8x2x8x128xf32>
    %20 = vector.extract_strided_slice %4 {offsets = [0, 0, 0, 128], sizes = [8, 2, 8, 128], strides = [1, 1, 1, 1]} : vector<8x2x8x256xf32> to vector<8x2x8x128xf32>
    %21 = arith.mulf %20, %20 : vector<8x2x8x128xf32>
    %cst_13 = arith.constant dense<0.000000e+00> : vector<8x2x8xf32>
    %22 = vector.multi_reduction <add>, %21, %cst_13 [3] : vector<8x2x8x128xf32> to vector<8x2x8xf32>
    %23 = vector.shape_cast %22 : vector<8x2x8xf32> to vector<8x2x8x1xf32>
    %cst_14 = arith.constant 1.280000e+02 : f32
    %24 = vector.broadcast %cst_14 : f32 to vector<8x2x8x1xf32>
    %25 = arith.divf %23, %24 : vector<8x2x8x1xf32>
    %cst_15 = arith.constant 9.99999974E-6 : f32
    %26 = vector.broadcast %cst_15 : f32 to vector<8x2x8x1xf32>
    %27 = arith.addf %25, %26 : vector<8x2x8x1xf32>
    %28 = math.rsqrt %27 : vector<8x2x8x1xf32>
    %29 = vector.broadcast %28 : vector<8x2x8x1xf32> to vector<8x2x8x128xf32>
    %30 = arith.mulf %20, %29 : vector<8x2x8x128xf32>
    %31 = vector.shape_cast %5 : vector<1x128xf32> to vector<1x1x1x128xf32>
    %32 = vector.broadcast %31 : vector<1x1x1x128xf32> to vector<8x2x8x128xf32>
    %33 = arith.mulf %30, %32 : vector<8x2x8x128xf32>
    %34 = vector.extract_strided_slice %19 {offsets = [0, 0, 0, 0], sizes = [8, 1, 8, 128], strides = [1, 1, 1, 1]} : vector<8x2x8x128xf32> to vector<8x1x8x128xf32>
    %35 = vector.shape_cast %34 : vector<8x1x8x128xf32> to vector<8x8x128xf32>
    %36 = vector.shape_cast %35 : vector<8x8x128xf32> to vector<64x128xf32>
    %c0_16 = arith.constant 0 : index
    %c0_17 = arith.constant 0 : index
    %c0_18 = arith.constant 0 : index
    %c0_19 = arith.constant 0 : index
    %37 = vector.load %arg5[%c0_16, %c0_17, %c0_18, %c0_19] : memref<2x2x128x256xf32, #tpu.memory_space<vmem>>, vector<1x1x128x256xf32>
    %38 = vector.shape_cast %37 : vector<1x1x128x256xf32> to vector<128x256xf32>
    %cst_20 = arith.constant dense<0.000000e+00> : vector<64x256xf32>
    %39 = tpu.matmul %36, %38, %cst_20 {dimension_numbers = #tpu.dot_dimension_numbers<[1], [0], [0], [1], [0, 0, 1, 1], [], []>} : vector<64x128xf32>, vector<128x256xf32>, vector<64x256xf32> -> vector<64x256xf32>
    %40 = vector.extract_strided_slice %33 {offsets = [0, 0, 0, 0], sizes = [8, 1, 8, 128], strides = [1, 1, 1, 1]} : vector<8x2x8x128xf32> to vector<8x1x8x128xf32>
    %41 = vector.shape_cast %40 : vector<8x1x8x128xf32> to vector<8x8x128xf32>
    %42 = vector.shape_cast %41 : vector<8x8x128xf32> to vector<64x128xf32>
    %c0_21 = arith.constant 0 : index
    %c1 = arith.constant 1 : index
    %c0_22 = arith.constant 0 : index
    %c0_23 = arith.constant 0 : index
    %43 = vector.load %arg5[%c0_21, %c1, %c0_22, %c0_23] : memref<2x2x128x256xf32, #tpu.memory_space<vmem>>, vector<1x1x128x256xf32>
    %44 = vector.shape_cast %43 : vector<1x1x128x256xf32> to vector<128x256xf32>
    %cst_24 = arith.constant dense<0.000000e+00> : vector<64x256xf32>
    %45 = tpu.matmul %42, %44, %cst_24 {dimension_numbers = #tpu.dot_dimension_numbers<[1], [0], [0], [1], [0, 0, 1, 1], [], []>} : vector<64x128xf32>, vector<128x256xf32>, vector<64x256xf32> -> vector<64x256xf32>
    %46 = arith.addf %39, %45 : vector<64x256xf32>
    %47 = vector.extract_strided_slice %19 {offsets = [0, 1, 0, 0], sizes = [8, 1, 8, 128], strides = [1, 1, 1, 1]} : vector<8x2x8x128xf32> to vector<8x1x8x128xf32>
    %48 = vector.shape_cast %47 : vector<8x1x8x128xf32> to vector<8x8x128xf32>
    %49 = vector.shape_cast %48 : vector<8x8x128xf32> to vector<64x128xf32>
    %c1_25 = arith.constant 1 : index
    %c0_26 = arith.constant 0 : index
    %c0_27 = arith.constant 0 : index
    %c0_28 = arith.constant 0 : index
    %50 = vector.load %arg5[%c1_25, %c0_26, %c0_27, %c0_28] : memref<2x2x128x256xf32, #tpu.memory_space<vmem>>, vector<1x1x128x256xf32>
    %51 = vector.shape_cast %50 : vector<1x1x128x256xf32> to vector<128x256xf32>
    %cst_29 = arith.constant dense<0.000000e+00> : vector<64x256xf32>
    %52 = tpu.matmul %49, %51, %cst_29 {dimension_numbers = #tpu.dot_dimension_numbers<[1], [0], [0], [1], [0, 0, 1, 1], [], []>} : vector<64x128xf32>, vector<128x256xf32>, vector<64x256xf32> -> vector<64x256xf32>
    %53 = arith.addf %46, %52 : vector<64x256xf32>
    %54 = vector.extract_strided_slice %33 {offsets = [0, 1, 0, 0], sizes = [8, 1, 8, 128], strides = [1, 1, 1, 1]} : vector<8x2x8x128xf32> to vector<8x1x8x128xf32>
    %55 = vector.shape_cast %54 : vector<8x1x8x128xf32> to vector<8x8x128xf32>
    %56 = vector.shape_cast %55 : vector<8x8x128xf32> to vector<64x128xf32>
    %c1_30 = arith.constant 1 : index
    %c1_31 = arith.constant 1 : index
    %c0_32 = arith.constant 0 : index
    %c0_33 = arith.constant 0 : index
    %57 = vector.load %arg5[%c1_30, %c1_31, %c0_32, %c0_33] : memref<2x2x128x256xf32, #tpu.memory_space<vmem>>, vector<1x1x128x256xf32>
    %58 = vector.shape_cast %57 : vector<1x1x128x256xf32> to vector<128x256xf32>
    %cst_34 = arith.constant dense<0.000000e+00> : vector<64x256xf32>
    %59 = tpu.matmul %56, %58, %cst_34 {dimension_numbers = #tpu.dot_dimension_numbers<[1], [0], [0], [1], [0, 0, 1, 1], [], []>} : vector<64x128xf32>, vector<128x256xf32>, vector<64x256xf32> -> vector<64x256xf32>
    %60 = arith.addf %53, %59 : vector<64x256xf32>
    %c0_35 = arith.constant 0 : index
    %c0_36 = arith.constant 0 : index
    %c0_37 = arith.constant 0 : index
    %61 = vector.load %arg6[%c0_35, %c0_36, %c0_37] : memref<1x64x256xf32, #tpu.memory_space<vmem>>, vector<1x64x256xf32>
    %62 = vector.shape_cast %61 : vector<1x64x256xf32> to vector<64x256xf32>
    %63 = vector.shape_cast %60 : vector<64x256xf32> to vector<1x64x256xf32>
    tpu.vector_store %arg6[%c0_35, %c0_36, %c0_37], %63 {strides = array<i32>} : memref<1x64x256xf32, #tpu.memory_space<vmem>>, vector<1x64x256xf32>,
    return
  }
  func.func @transform_0(%arg0: i32, %arg1: i32) -> (i32, i32, i32, i32, i32) {
    %c0_i32 = arith.constant 0 : i32
    %c0_i32_0 = arith.constant 0 : i32
    %c0_i32_1 = arith.constant 0 : i32
    %c0_i32_2 = arith.constant 0 : i32
    return %arg0, %arg1, %c0_i32, %c0_i32_0, %c0_i32_1 : i32, i32, i32, i32, i32
  }
  func.func @transform_1(%arg0: i32, %arg1: i32) -> (i32, i32, i32, i32, i32) {
    %c0_i32 = arith.constant 0 : i32
    %c0_i32_0 = arith.constant 0 : i32
    %c0_i32_1 = arith.constant 0 : i32
    %c0_i32_2 = arith.constant 0 : i32
    return %arg0, %arg1, %c0_i32, %c0_i32_0, %c0_i32_1 : i32, i32, i32, i32, i32
  }
  func.func @transform_2(%arg0: i32, %arg1: i32) -> (i32, i32) {
    %c0_i32 = arith.constant 0 : i32
    %c0_i32_0 = arith.constant 0 : i32
    %c0_i32_1 = arith.constant 0 : i32
    return %c0_i32, %c0_i32_0 : i32, i32
  }
  func.func @transform_3(%arg0: i32, %arg1: i32) -> (i32, i32, i32, i32) {
    %c0_i32 = arith.constant 0 : i32
    %c0_i32_0 = arith.constant 0 : i32
    %c0_i32_1 = arith.constant 0 : i32
    %c0_i32_2 = arith.constant 0 : i32
    %c0_i32_3 = arith.constant 0 : i32
    return %c0_i32, %c0_i32_0, %c0_i32_1, %c0_i32_2 : i32, i32, i32, i32
  }
  func.func @transform_4(%arg0: i32, %arg1: i32) -> (i32, i32, i32) {
    %c0_i32 = arith.constant 0 : i32
    %c0_i32_0 = arith.constant 0 : i32
    return %arg0, %arg1, %c0_i32 : i32, i32, i32
  }
}

</mosaic_0001>

<bundles_post_ra>
// kernel: _lambda_.1
= control target key start
LH: loop header
LB: loop body
LE: loop exit
PB: predicated region body
PF: predicated region fallthrough
CT: control target
= control target key end

     0   :  { %9 = vsyncpa [#allocation3], 0  ;;  %s2727_s0 = inlined_call_operand.vmem [shape: f32[2,8,2,8,256], index: 0, kind: input, shape index: {}]   ;;  %s2728_s1 = inlined_call_operand.vmem [shape: f32[2,8,2,8,256], index: 1, kind: input, shape index: {}]   ;;  %s2729_s2 = inlined_call_operand.vmem [shape: f32[1,128], index: 2, kind: input, shape index: {}]   ;;  %s2730_s3 = inlined_call_operand.vmem [shape: f32[2,2,128,256], index: 3, kind: input, shape index: {}]   ;;  %s2731_s4 = inlined_call_operand.hbm [shape: f32[2,64,256], index: 4, kind: output, shape index: {}]  }
   0x1   :  { %11 = vsyncpa [#allocation3 + $0x1], 0  ;;  %s1902_s15 = smov 0   ;;  %s1904_s16 = smov 0  }
   0x2   :  { %s1906_s17 = smov 0   ;;  %s1908_s18 = smov 0  }
   0x3   :  { %s1910_s19 = smov 0   ;;  %s1912_s20 = smov 0  }
   0x4 LB: > { %s1380_s21 = sadd.s32 4294967295, %s1871_s20   ;;  %s1381_s22 = sadd.s32 4294967294, %s1871_s20   ;;  %s1871_s20 = sphi %s1912_s20, %s17_s20   ;;  %s1867_s19 = sphi %s1910_s19, %s2738_s19   ;;  %s1863_s18 = sphi %s1908_s18, %s2737_s18   ;;  %s1859_s17 = sphi %s1906_s17, %s2736_s17   ;;  %s1855_s16 = sphi %s1904_s16, %s2735_s16   ;;  %s1851_s15 = sphi %s1902_s15, %s2734_s15  }
   0x5   : > { %s29_s23 = sadd.s32 1, %s1867_s19  ;;  %s136_s24 = sadd.s32 1, %s1859_s17 }
   0x6   : > { %p31_p0 = scmp.ge.s32.totalorder %s29_s23, 2  ;;  %p146_p1 = scmp.ne.s32.totalorder %s1859_s17, %s1855_s16 }
   0x7   : > { %p147_p2 = scmp.eq.s32.totalorder %s1380_s21, 1  ;;  %p152_p3 = scmp.ne.s32.totalorder %s1855_s16, %s1851_s15 }
   0x8   : > { %s2740_s23 = smov (%p31_p0, %s29_s23), 0  ;;  %p153_p5 = scmp.eq.s32.totalorder %s1381_s22, 1 }
   0x9   : > { %p1942_p4 = por %p147_p2, %p146_p1  ;;  %s131_s26 = ssub.s32 %s1867_s19, %s2740_s23 }
   0xa   : > { %p1384_p6 = scmp.ge.s32.totalorder %s1871_s20, 1  ;;  %p134_p7 = scmp.eq.s32.totalorder %s131_s26, 0 }
   0xb   : > { %p1949_p8 = por %p153_p5, %p152_p3  ;;  %p205_p9 = scmp.lt.s32.totalorder %s1871_s20, 3 }
   0xc   : > { %s1955_s28 = scalar_select %p134_p7, %s1859_s17, %s136_s24  }
   0xd   : > { %p206_p10 = pnand %p1384_p6, %p205_p9 }
   0xe   : > { %p247_p11 = scmp.lt.s32.totalorder (!%p206_p10), %s1863_s18, 1  ;;  %v1424_v0 = vld [vmem:[%s2730_s3 + $0x208] sm:$0xff] (!%p206_p10)  ;;  %v1426_v1 = vld [vmem:[%s2730_s3 + $0x218] sm:$0xff] (!%p206_p10)  ;;  %v1423_v2 = vld [vmem:[%s2730_s3 + $0x200] sm:$0xff] (!%p206_p10)  ;;  %s243_s11 = sand.u32 (!%p206_p10), 1, %s1855_s16  }
   0xf   : > { %209 = sbr.rel (%p206_p10) target bundleno = 489 (0x1e9), region = 36  ;;  %v1559_v3 = vpack.c.bf16 (!%p206_p10), %v1426_v1, %v1424_v0  ;;  %v1425_v4 = vld [vmem:[%s2730_s3 + $0x210] sm:$0xff] (!%p206_p10)  ;;  %v1392_v5 = vld [vmem:[%s2730_s3 + $0x108] sm:$0xff] (!%p206_p10)  ;;  %v1394_v6 = vld [vmem:[%s2730_s3 + $0x118] sm:$0xff] (!%p206_p10)  ;;  %s1385_s13 = sshll.u32 (!%p206_p10), %s243_s11, 7 }
  0x10   : > { %v1561_v7 = vpack.c.bf16 (!%p206_p10), %v1425_v4, %v1423_v2  ;;  %v1495_v8 = vpack.c.bf16 (!%p206_p10), %v1394_v6, %v1392_v5  ;;  %v1391_v9 = vld [vmem:[%s2730_s3 + $0x100] sm:$0xff] (!%p206_p10)  ;;  %v1393_v10 = vld [vmem:[%s2730_s3 + $0x110] sm:$0xff] (!%p206_p10)  ;;  %v1428_v11 = vld [vmem:[%s2730_s3 + $0x228] sm:$0xff] (!%p206_p10)  ;;  %s2652_s14 = scalar_lea.vmem (!%p206_p10), [#allocation2], %s1385_s13  ;;  %s1494_s22 = sshll.u32 (!%p206_p10), %s1863_s18, 11 }
  0x11   : > { %1560 = vmatprep.subr.bf16.mxu0 (!%p206_p10), %v1559_v3  ;;  %v1497_v12 = vpack.c.bf16 (!%p206_p10), %v1393_v10, %v1391_v9  ;;  %v1430_v13 = vld [vmem:[%s2730_s3 + $0x238] sm:$0xff] (!%p206_p10)  ;;  %v1427_v14 = vld [vmem:[%s2730_s3 + $0x220] sm:$0xff] (!%p206_p10)  ;;  %v1429_v15 = vld [vmem:[%s2730_s3 + $0x230] sm:$0xff] (!%p206_p10)  ;;  %s1874_s29 = smov (!%p206_p10), [#allocation2]  }
  0x12   : > { %1562 = vmatpush1.bf16.msra.mxu0 (!%p206_p10), %v1561_v7  ;;  %1496 = vmatprep.subr.bf16.mxu1 (!%p206_p10), %v1495_v8  ;;  %v1563_v16 = vpack.c.bf16 (!%p206_p10), %v1430_v13, %v1428_v11  ;;  %v1565_v17 = vpack.c.bf16 (!%p206_p10), %v1429_v15, %v1427_v14  ;;  %v1396_v18 = vld [vmem:[%s2730_s3 + $0x128] sm:$0xff] (!%p206_p10)  ;;  %v1398_v19 = vld [vmem:[%s2730_s3 + $0x138] sm:$0xff] (!%p206_p10)  ;;  %v1395_v20 = vld [vmem:[%s2730_s3 + $0x120] sm:$0xff] (!%p206_p10)  ;;  %s1797_s30 = sshll.u32 (!%p206_p10), %s1874_s29, 4  ;;  %s1798_s30 = int_to_ptr.vmem [resolvable:$false] %s1797_s30 }
  0x13   : > { %1498 = vmatpush1.bf16.msra.mxu1 (!%p206_p10), %v1497_v12  ;;  %v1499_v21 = vpack.c.bf16 (!%p206_p10), %v1398_v19, %v1396_v18  ;;  %v1397_v22 = vld [vmem:[%s2730_s3 + $0x130] sm:$0xff] (!%p206_p10)  ;;  %v1432_v23 = vld [vmem:[%s2730_s3 + $0x248] sm:$0xff] (!%p206_p10)  ;;  %v1434_v24 = vld [vmem:[%s2730_s3 + $0x258] sm:$0xff] (!%p206_p10)  ;;  %s1799_s5 = scalar_lea.vmem (!%p206_p10), %s1798_s30, 4096 }
  0x14   : > { %1564 = vmatprep.subr.bf16.mxu0 (!%p206_p10), %v1563_v16  ;;  %v1501_v28 = vpack.c.bf16 (!%p206_p10), %v1397_v22, %v1395_v20  ;;  %v1567_v29 = vpack.c.bf16 (!%p206_p10), %v1434_v24, %v1432_v23  ;;  %v1431_v19 = vld [vmem:[%s2730_s3 + $0x240] sm:$0xff] (!%p206_p10)  ;;  %v1433_v20 = vld [vmem:[%s2730_s3 + $0x250] sm:$0xff] (!%p206_p10)  ;;  %v1400_v24 = vld [vmem:[%s2730_s3 + $0x148] sm:$0xff] (!%p206_p10) }
  0x15   : > { %1500 = vmatprep.subr.bf16.mxu1 (!%p206_p10), %v1499_v21  ;;  %v1569_v23 = vpack.c.bf16 (!%p206_p10), %v1433_v20, %v1431_v19  ;;  %v1443_v19 = vld [vmem:[%s2730_s3 + $0x2a0] sm:$0xff] (!%p206_p10)  ;;  %v1445_v20 = vld [vmem:[%s2730_s3 + $0x2b0] sm:$0xff] (!%p206_p10) }
  0x16   : > { %s248_s21 = scalar_select %p247_p11, %s1863_s18, 1  ;;  %1566 = vmatpush1.bf16.msra.mxu0 %v1565_v17 }
  0x17   : > { %1502 = vmatpush1.bf16.msra.mxu1 %v1501_v28  ;;  %1568 = vmatprep.subr.bf16.mxu0 %v1567_v29  ;;  %v1401_v28 = vld [vmem:[%s2730_s3 + $0x150] sm:$0xff]  ;;  %v1436_v29 = vld [vmem:[%s2730_s3 + $0x268] sm:$0xff]  ;;  %s2681_s18 = scalar_lea.sflag [#allocation3], %s243_s11 }
  0x18   : > { %s1492_s12 = sshll.u32 %s248_s21, 8 }
  0x19   : > { %s2007_s21 = scalar_lea.vmem %s2727_s0, %s1492_s12  ;;  %s2012_s8 = scalar_lea.vmem %s2728_s1, %s1492_s12 }
  0x1a   : > { %v275_v25 = vld [vmem:[%s2007_s21 + $0x30] sm:$0xff]  ;;  %v274_v32 = vld [vmem:[%s2007_s21 + $0x28] sm:$0xff]  ;;  %1570 = vmatpush1.bf16.msra.mxu0 %v1569_v23  ;;  %s1277_s12 = sshll.u32 %s2652_s14, 4  ;;  %s2675_s12 = int_to_ptr.vmem [resolvable:$true] %s1277_s12 }
  0x1b   : > { %v307_v26 = vld [vmem:[%s2012_s8 + $0x30] sm:$0xff]  ;;  %v306_v33 = vld [vmem:[%s2012_s8 + $0x28] sm:$0xff]  ;;  %s1793_s26 = scalar_lea.vmem %s2675_s12, 2048  ;;  %p1800_p1 = scmp.lt.s32.totalorder %s2675_s12, %s1798_s30 }
  0x1c   : > { %v271_v27 = vld [vmem:[%s2007_s21 + $0x10] sm:$0xff]  ;;  %v2026_v30 = vadd.f32 %v307_v26, %v275_v25  ;;  %v2033_v35 = vadd.f32 %v306_v33, %v274_v32  ;;  %v270_v36 = vld [vmem:[%s2007_s21 + $0x8] sm:$0xff]  ;;  %v1402_v25 = vld [vmem:[%s2730_s3 + $0x158] sm:$0xff]  ;;  %p1794_p12 = scmp.ne.s32.totalorder %s2675_s12, %s1793_s26  ;;  %p1801_p2 = scmp.lt.s32.totalorder %s1799_s5, %s1793_s26 }
  0x1d   : > { %v303_v31 = vld [vmem:[%s2012_s8 + $0x10] sm:$0xff]  ;;  %v302_v37 = vld [vmem:[%s2012_s8 + $0x8] sm:$0xff]  ;;  %v1399_v26 = vld [vmem:[%s2730_s3 + $0x140] sm:$0xff] }
  0x1e   : > { %v2031_v34 = vadd.f32 %v303_v31, %v271_v27  ;;  %v278_v38 = vld [vmem:[%s2007_s21 + $0x48] sm:$0xff]  ;;  %v369_v39 = vmul.f32 %v2026_v30, %v2026_v30  ;;  %v2040_v40 = vadd.f32 %v302_v37, %v270_v36  ;;  %v279_v42 = vld [vmem:[%s2007_s21 + $0x50] sm:$0xff]  ;;  %v503_v45 = vmul.f32 %v2033_v35, %v2033_v35  ;;  %v1438_v31 = vld [vmem:[%s2730_s3 + $0x278] sm:$0xff]  ;;  %p1795_p13 = pnand %p1794_p12, %p1942_p4  ;;  %p1802_p3 = por %p1801_p2, %p1800_p1 }
  0x1f   : > { %v310_v41 = vld [vmem:[%s2012_s8 + $0x48] sm:$0xff]  ;;  %v311_v43 = vld [vmem:[%s2012_s8 + $0x50] sm:$0xff]  ;;  %v1503_v27 = vpack.c.bf16 %v1402_v25, %v1400_v24  ;;  %v272_v33 = vld [vmem:[%s2007_s21 + $0x18] sm:$0xff]  ;;  %v1505_v37 = vpack.c.bf16 %v1401_v28, %v1399_v26 }
  0x20   : > { %v367_v44 = vmul.f32 %v2031_v34, %v2031_v34  ;;  %388 = vadd.xlane.f32.xlu1 %v369_v39  ;;  %v2049_v46 = vadd.f32 %v310_v41, %v278_v38  ;;  %v501_v47 = vmul.f32 %v2040_v40, %v2040_v40  ;;  %v2053_v48 = vadd.f32 %v311_v43, %v279_v42  ;;  %v282_v49 = vld [vmem:[%s2007_s21 + $0x68] sm:$0xff]  ;;  %v283_v51 = vld [vmem:[%s2007_s21 + $0x70] sm:$0xff]  ;;  %v304_v36 = vld [vmem:[%s2012_s8 + $0x18] sm:$0xff]  ;;  %p1796_p0 = pneg %p1795_p13 }
  0x21   : > { %v314_v50 = vld [vmem:[%s2012_s8 + $0x68] sm:$0xff]  ;;  %v315_v52 = vld [vmem:[%s2012_s8 + $0x70] sm:$0xff]  ;;  %v1571_v38 = vpack.c.bf16 %v1438_v31, %v1436_v29  ;;  %v1435_v39 = vld [vmem:[%s2730_s3 + $0x260] sm:$0xff]  ;;  %1504 = vmatprep.subr.bf16.mxu1 %v1503_v27 }
  0x22   : > { %384 = vadd.xlane.f32.xlu0 %v367_v44  ;;  %v505_v53 = vmul.f32 %v2049_v46, %v2049_v46  ;;  %v2061_v54 = vadd.f32 %v314_v50, %v282_v49  ;;  %v371_v55 = vmul.f32 %v2053_v48, %v2053_v48  ;;  %v2065_v56 = vadd.f32 %v315_v52, %v283_v51  ;;  %v286_v57 = vld [vmem:[%s2007_s21 + $0x88] sm:$0xff]  ;;  %v287_v59 = vld [vmem:[%s2007_s21 + $0x90] sm:$0xff]  ;;  %v1406_v50 = vld [vmem:[%s2730_s3 + $0x178] sm:$0xff]  ;;  %p1803_p5 = pnand %p1802_p3, %p1796_p0 }
  0x23   : > { %v318_v58 = vld [vmem:[%s2012_s8 + $0x88] sm:$0xff]  ;;  %v319_v60 = vld [vmem:[%s2012_s8 + $0x90] sm:$0xff]  ;;  %v1403_v51 = vld [vmem:[%s2730_s3 + $0x160] sm:$0xff]  ;;  %1506 = vmatpush1.bf16.msra.mxu1 %v1505_v37  ;;  %1572 = vmatprep.subr.bf16.mxu0 %v1571_v38  ;;  %v1581_v38 = vpack.c.bf16 %v1445_v20, %v1443_v19 }
  0x24   : > { %521 = vadd.xlane.f32.xlu1 %v503_v45  ;;  %v507_v61 = vmul.f32 %v2061_v54, %v2061_v54  ;;  %v2073_v62 = vadd.f32 %v318_v58, %v286_v57  ;;  %v373_v63 = vmul.f32 %v2065_v56, %v2065_v56  ;;  %v2077_v0 = vadd.f32 %v319_v60, %v287_v59  ;;  %v290_v1 = vld [vmem:[%s2007_s21 + $0xa8] sm:$0xff]  ;;  %v291_v3 = vld [vmem:[%s2007_s21 + $0xb0] sm:$0xff]  ;;  %v269_v45 = vld [vmem:[%s2007_s21] sm:$0xff] }
  0x25   : > { %v322_v2 = vld [vmem:[%s2012_s8 + $0xa8] sm:$0xff]  ;;  %v323_v4 = vld [vmem:[%s2012_s8 + $0xb0] sm:$0xff]  ;;  %v1442_v59 = vld [vmem:[%s2730_s3 + $0x298] sm:$0xff] }
  0x26   : > { %517 = vadd.xlane.f32.xlu0 %v501_v47  ;;  %v509_v5 = vmul.f32 %v2073_v62, %v2073_v62  ;;  %v2085_v6 = vadd.f32 %v322_v2, %v290_v1  ;;  %v375_v7 = vmul.f32 %v2077_v0, %v2077_v0  ;;  %v2089_v8 = vadd.f32 %v323_v4, %v291_v3  ;;  %v294_v9 = vld [vmem:[%s2007_s21 + $0xc8] sm:$0xff]  ;;  %v295_v11 = vld [vmem:[%s2007_s21 + $0xd0] sm:$0xff]  ;;  %v301_v47 = vld [vmem:[%s2012_s8] sm:$0xff] }
  0x27   : > { %v326_v10 = vld [vmem:[%s2012_s8 + $0xc8] sm:$0xff]  ;;  %v327_v12 = vld [vmem:[%s2012_s8 + $0xd0] sm:$0xff]  ;;  %v1439_v60 = vld [vmem:[%s2730_s3 + $0x280] sm:$0xff] }
  0x28   : > { %525 = vadd.xlane.f32.xlu1 %v505_v53  ;;  %v298_v13 = vld [vmem:[%s2007_s21 + $0xe8] sm:$0xff]  ;;  %v299_v15 = vld [vmem:[%s2007_s21 + $0xf0] sm:$0xff]  ;;  %v511_v16 = vmul.f32 %v2085_v6, %v2085_v6  ;;  %v2100_v17 = vadd.f32 %v326_v10, %v294_v9  ;;  %v377_v21 = vmul.f32 %v2089_v8, %v2089_v8  ;;  %v2111_v22 = vadd.f32 %v327_v12, %v295_v11  ;;  %v1410_v2 = vld [vmem:[%s2730_s3 + $0x198] sm:$0xff] }
  0x29   : > { %v330_v14 = vld [vmem:[%s2012_s8 + $0xe8] sm:$0xff]  ;;  %v331_v18 = vld [vmem:[%s2012_s8 + $0xf0] sm:$0xff]  ;;  %v276_v3 = vld [vmem:[%s2007_s21 + $0x38] sm:$0xff] }
  0x2a   : > { %392 = vadd.xlane.f32.xlu0 %v371_v55  ;;  %v2131_v32 = vadd.f32 %v330_v14, %v298_v13  ;;  %v1437_v41 = vld [vmem:[%s2730_s3 + $0x270] sm:$0xff]  ;;  %v1404_v42 = vld [vmem:[%s2730_s3 + $0x168] sm:$0xff]  ;;  %v513_v43 = vmul.f32 %v2100_v17, %v2100_v17  ;;  %v2146_v44 = vadd.f32 %v331_v18, %v299_v15  ;;  %v379_v53 = vmul.f32 %v2111_v22, %v2111_v22  ;;  %v308_v4 = vld [vmem:[%s2012_s8 + $0x38] sm:$0xff] }
  0x2b   : > { %v1573_v49 = vpack.c.bf16 %v1437_v41, %v1435_v39  ;;  %v1405_v52 = vld [vmem:[%s2730_s3 + $0x170] sm:$0xff]  ;;  %v1507_v55 = vpack.c.bf16 %v1406_v50, %v1404_v42  ;;  %v1440_v58 = vld [vmem:[%s2730_s3 + $0x288] sm:$0xff]  ;;  %v1407_v9 = vld [vmem:[%s2730_s3 + $0x180] sm:$0xff]  ;;  %v2194_v14 = vadd.f32 %v304_v36, %v272_v33  ;;  %v2234_v42 = vadd.f32 %v308_v4, %v276_v3 }
  0x2c   : > { %529 = vadd.xlane.f32.xlu1 %v507_v61  ;;  %v1509_v57 = vpack.c.bf16 %v1405_v52, %v1403_v51  ;;  %v1575_v61 = vpack.c.bf16 %v1442_v59, %v1440_v58  ;;  %v1408_v1 = vld [vmem:[%s2730_s3 + $0x188] sm:$0xff]  ;;  %v1409_v10 = vld [vmem:[%s2730_s3 + $0x190] sm:$0xff]  ;;  %v515_v12 = vmul.f32 %v2131_v32, %v2131_v32  ;;  %v381_v13 = vmul.f32 %v2146_v44, %v2146_v44  ;;  %v273_v15 = vld [vmem:[%s2007_s21 + $0x20] sm:$0xff] }
  0x2d   : > { %1574 = vmatpush1.bf16.msra.mxu0 %v1573_v49  ;;  %1508 = vmatprep.subr.bf16.mxu1 %v1507_v55  ;;  %v1444_v11 = vld [vmem:[%s2730_s3 + $0x2a8] sm:$0xff]  ;;  %v1446_v18 = vld [vmem:[%s2730_s3 + $0x2b8] sm:$0xff]  ;;  %v1513_v23 = vpack.c.bf16 %v1409_v10, %v1407_v9  ;;  %v1411_v27 = vld [vmem:[%s2730_s3 + $0x1a0] sm:$0xff]  ;;  %v502_v41 = vmul.f32 %v2194_v14, %v2194_v14  ;;  %v504_v4 = vmul.f32 %v2234_v42, %v2234_v42 }
  0x2e   : > { %396 = vadd.xlane.f32.xlu0 %v373_v63  ;;  %v1441_v63 = vld [vmem:[%s2730_s3 + $0x290] sm:$0xff]  ;;  %1576 = vmatprep.subr.bf16.mxu0 %v1575_v61  ;;  %v1579_v24 = vpack.c.bf16 %v1446_v18, %v1444_v11  ;;  %v1412_v25 = vld [vmem:[%s2730_s3 + $0x1a8] sm:$0xff]  ;;  %v1414_v26 = vld [vmem:[%s2730_s3 + $0x1b8] sm:$0xff] }
  0x2f   : > { %1510 = vmatpush1.bf16.msra.mxu1 %v1509_v57  ;;  %v1515_v28 = vpack.c.bf16 %v1414_v26, %v1412_v25  ;;  %v1413_v29 = vld [vmem:[%s2730_s3 + $0x1b0] sm:$0xff]  ;;  %v1448_v31 = vld [vmem:[%s2730_s3 + $0x2c8] sm:$0xff]  ;;  %v1450_v33 = vld [vmem:[%s2730_s3 + $0x2d8] sm:$0xff] }
  0x30   : > { %533 = vadd.xlane.f32.xlu1 %v509_v5  ;;  %v1577_v5 = vpack.c.bf16 %v1441_v63, %v1439_v60  ;;  %v280_v36 = vld [vmem:[%s2007_s21 + $0x58] sm:$0xff]  ;;  %v1416_v39 = vld [vmem:[%s2730_s3 + $0x1c8] sm:$0xff]  ;;  %v277_v52 = vld [vmem:[%s2007_s21 + $0x40] sm:$0xff] }
  0x31   : > { %v312_v37 = vld [vmem:[%s2012_s8 + $0x58] sm:$0xff]  ;;  %v1452_v55 = vld [vmem:[%s2730_s3 + $0x2e8] sm:$0xff]  ;;  %v309_v58 = vld [vmem:[%s2012_s8 + $0x40] sm:$0xff] }
  0x32   : > { %400 = vadd.xlane.f32.xlu0 %v375_v7  ;;  %v1511_v7 = vpack.c.bf16 %v1410_v2, %v1408_v1  ;;  %1578 = vmatpush1.bf16.msra.mxu0 %v1577_v5  ;;  %v1418_v49 = vld [vmem:[%s2730_s3 + $0x1d8] sm:$0xff]  ;;  %v1415_v60 = vld [vmem:[%s2730_s3 + $0x1c0] sm:$0xff]  ;;  %v1417_v61 = vld [vmem:[%s2730_s3 + $0x1d0] sm:$0xff]  ;;  %v2272_v5 = vadd.f32 %v312_v37, %v280_v36 }
  0x33   : > { %1580 = vmatprep.subr.bf16.mxu0 %v1579_v24  ;;  %v1454_v57 = vld [vmem:[%s2730_s3 + $0x2f8] sm:$0xff]  ;;  %v1519_v59 = vpack.c.bf16 %v1418_v49, %v1416_v39  ;;  %v1420_v2 = vld [vmem:[%s2730_s3 + $0x1e8] sm:$0xff]  ;;  %v1451_v10 = vld [vmem:[%s2730_s3 + $0x2e0] sm:$0xff]  ;;  %v1873_v24 = vmov 0.0  }
  0x34   : > { %537 = vadd.xlane.f32.xlu1 %v511_v16  ;;  %v305_v16 = vld [vmem:[%s2012_s8 + $0x20] sm:$0xff]  ;;  %1512 = vmatprep.subr.bf16.mxu1 %v1511_v7  ;;  %v284_v63 = vld [vmem:[%s2007_s21 + $0x78] sm:$0xff]  ;;  %v1587_v9 = vpack.c.bf16 %v1454_v57, %v1452_v55  ;;  %v1453_v11 = vld [vmem:[%s2730_s3 + $0x2f0] sm:$0xff] }
  0x35   : > { %v2247_v51 = vadd.f32 %v305_v16, %v273_v15  ;;  %1514 = vmatpush1.bf16.msra.mxu1 %v1513_v23  ;;  %v1422_v3 = vld [vmem:[%s2730_s3 + $0x1f8] sm:$0xff]  ;;  %v281_v15 = vld [vmem:[%s2007_s21 + $0x60] sm:$0xff]  ;;  %v1521_v16 = vpack.c.bf16 %v1417_v61, %v1415_v60  ;;  %v1456_v18 = vld [vmem:[%s2730_s3 + $0x308] sm:$0xff]  ;;  %1017 = vmatprep.mubr.f32.mxu0 %v1873_v24 }
  0x36   : > { %404 = vadd.xlane.f32.xlu0 %v377_v21  ;;  %v2207_v21 = vadd.f32 %v301_v47, %v269_v45  ;;  %v1447_v45 = vld [vmem:[%s2730_s3 + $0x2c0] sm:$0xff]  ;;  %v1449_v47 = vld [vmem:[%s2730_s3 + $0x2d0] sm:$0xff]  ;;  %1516 = vmatprep.subr.bf16.mxu1 %v1515_v28  ;;  %v316_v7 = vld [vmem:[%s2012_s8 + $0x78] sm:$0xff]  ;;  %v1523_v23 = vpack.c.bf16 %v1422_v3, %v1420_v2 }
  0x37   : > { %1582 = vmatpush1.bf16.msra.mxu0 %v1581_v38  ;;  %v1585_v1 = vpack.c.bf16 %v1449_v47, %v1447_v45  ;;  %v1458_v19 = vld [vmem:[%s2730_s3 + $0x318] sm:$0xff]  ;;  %v313_v20 = vld [vmem:[%s2012_s8 + $0x60] sm:$0xff]  ;;  %v1421_v26 = vld [vmem:[%s2730_s3 + $0x1f0] sm:$0xff]  ;;  %758 = vmatprep.mubr.f32.mxu1 %v1873_v24 }
  0x38   : > { %541 = vadd.xlane.f32.xlu1 %v513_v43  ;;  %v1583_v43 = vpack.c.bf16 %v1450_v33, %v1448_v31  ;;  %v366_v50 = vmul.f32 %v2207_v21, %v2207_v21  ;;  %v1419_v25 = vld [vmem:[%s2730_s3 + $0x1e0] sm:$0xff]  ;;  %v630_v28 = vld [vmem:[%s2730_s3 + $0x8] sm:$0xff]  ;;  %v506_v31 = vmul.f32 %v2272_v5, %v2272_v5  ;;  %v2309_v33 = vadd.f32 %v316_v7, %v284_v63  ;;  %v288_v38 = vld [vmem:[%s2007_s21 + $0x98] sm:$0xff] }
  0x39   : > { %v1591_v36 = vpack.c.bf16 %v1458_v19, %v1456_v18  ;;  %v320_v39 = vld [vmem:[%s2012_s8 + $0x98] sm:$0xff]  ;;  %v285_v45 = vld [vmem:[%s2007_s21 + $0x80] sm:$0xff] }
  0x3a   : > { %408 = vadd.xlane.f32.xlu0 %v379_v53  ;;  %v1517_v53 = vpack.c.bf16 %v1413_v29, %v1411_v27  ;;  %1584 = vmatprep.subr.bf16.mxu0 %v1583_v43  ;;  %v1589_v27 = vpack.c.bf16 %v1453_v11, %v1451_v10  ;;  %v632_v29 = vld [vmem:[%s2730_s3 + $0x18] sm:$0xff]  ;;  %v1525_v43 = vpack.c.bf16 %v1421_v26, %v1419_v25  ;;  %v317_v47 = vld [vmem:[%s2012_s8 + $0x80] sm:$0xff] }
  0x3b   : > { %1586 = vmatpush1.bf16.msra.mxu0 %v1585_v1  ;;  %v1527_v49 = vpack.c.bf16 %v632_v29, %v630_v28  ;;  %v292_v55 = vld [vmem:[%s2007_s21 + $0xb8] sm:$0xff]  ;;  %v321_v60 = vld [vmem:[%s2012_s8 + $0xa0] sm:$0xff] }
  0x3c   : > { %545 = vadd.xlane.f32.xlu1 %v515_v12  ;;  %v368_v12 = vmul.f32 %v2247_v51, %v2247_v51  ;;  %1518 = vmatpush1.bf16.msra.mxu1 %v1517_v53  ;;  %v324_v57 = vld [vmem:[%s2012_s8 + $0xb8] sm:$0xff]  ;;  %v293_v7 = vld [vmem:[%s2007_s21 + $0xc0] sm:$0xff] }
  0x3d   : > { %1520 = vmatprep.subr.bf16.mxu1 %v1519_v59  ;;  %1588 = vmatprep.subr.bf16.mxu0 %v1587_v9  ;;  %v289_v59 = vld [vmem:[%s2007_s21 + $0xa0] sm:$0xff]  ;;  %v2333_v63 = vadd.f32 %v324_v57, %v292_v55  ;;  %v296_v2 = vld [vmem:[%s2007_s21 + $0xd8] sm:$0xff] }
  0x3e   : > { %412 = vadd.xlane.f32.xlu0 %v381_v13  ;;  %v2283_v13 = vadd.f32 %v309_v58, %v277_v52  ;;  %v2321_v52 = vadd.f32 %v320_v39, %v288_v38  ;;  %v2327_v58 = vadd.f32 %v317_v47, %v285_v45  ;;  %v328_v3 = vld [vmem:[%s2012_s8 + $0xd8] sm:$0xff]  ;;  %v325_v9 = vld [vmem:[%s2012_s8 + $0xc0] sm:$0xff] }
  0x3f   : > { %1590 = vmatpush1.bf16.msra.mxu0 %v1589_v27  ;;  %v512_v10 = vmul.f32 %v2333_v63, %v2333_v63  ;;  %v2345_v11 = vadd.f32 %v328_v3, %v296_v2  ;;  %v2351_v18 = vadd.f32 %v325_v9, %v293_v7  ;;  %v297_v19 = vld [vmem:[%s2007_s21 + $0xe0] sm:$0xff] }
  0x40   : > { %519 = vadd.xlane.f32.xlu1 %v502_v41  ;;  %v370_v37 = vmul.f32 %v2283_v13, %v2283_v13  ;;  %v2315_v41 = vadd.f32 %v313_v20, %v281_v15  ;;  %1522 = vmatpush1.bf16.msra.mxu1 %v1521_v16  ;;  %v510_v61 = vmul.f32 %v2321_v52, %v2321_v52  ;;  %v300_v15 = vld [vmem:[%s2007_s21 + $0xf8] sm:$0xff]  ;;  %v329_v20 = vld [vmem:[%s2012_s8 + $0xe0] sm:$0xff] }
  0x41   : > { %1524 = vmatprep.subr.bf16.mxu1 %v1523_v23  ;;  %1592 = vmatprep.subr.bf16.mxu0 %v1591_v36  ;;  %v374_v1 = vmul.f32 %v2327_v58, %v2327_v58  ;;  %v332_v16 = vld [vmem:[%s2012_s8 + $0xf8] sm:$0xff]  ;;  %v514_v23 = vmul.f32 %v2345_v11, %v2345_v11  ;;  %v378_v26 = vmul.f32 %v2351_v18, %v2351_v18  ;;  %s2673_s8 = scalar_lea.hbm %s2731_s4, %s1494_s22 }
  0x42   : > { %382 = vadd.xlane.f32.xlu0 %v366_v50  ;;  %v508_v50 = vmul.f32 %v2309_v33, %v2309_v33  ;;  %v372_v53 = vmul.f32 %v2315_v41, %v2315_v41  ;;  %v2357_v25 = vadd.f32 %v332_v16, %v300_v15  ;;  %v2361_v27 = vadd.f32 %v329_v20, %v297_v19  ;;  %v1455_v16 = vld [vmem:[%s2730_s3 + $0x300] sm:$0xff]  ;;  %v1457_v19 = vld [vmem:[%s2730_s3 + $0x310] sm:$0xff] }
  0x44   : > { %523 = vadd.xlane.f32.xlu1 %v504_v4  ;;  %1526 = vmatpush1.bf16.msra.mxu1 %v1525_v43  ;;  %v2339_v4 = vadd.f32 %v321_v60, %v289_v59  ;;  %v516_v28 = vmul.f32 %v2357_v25, %v2357_v25  ;;  %v380_v29 = vmul.f32 %v2361_v27, %v2361_v27 }
  0x45   : > { %1528 = vmatprep.subr.bf16.mxu1 %v1527_v49 }
  0x46   : > { %386 = vadd.xlane.f32.xlu0 %v368_v12  ;;  %v376_v12 = vmul.f32 %v2339_v4, %v2339_v4 }
  0x48   : > { %527 = vadd.xlane.f32.xlu1 %v506_v31 }
  0x4a   : > { %390 = vadd.xlane.f32.xlu0 %v370_v37 }
  0x4c   : > { %531 = vadd.xlane.f32.xlu1 %v508_v50 }
  0x4e   : > { %394 = vadd.xlane.f32.xlu0 %v372_v53 }
  0x50   : > { %535 = vadd.xlane.f32.xlu1 %v510_v61 }
  0x52   : > { %398 = vadd.xlane.f32.xlu0 %v374_v1 }
  0x54   : > { %539 = vadd.xlane.f32.xlu1 %v512_v10 }
  0x56   : > { %402 = vadd.xlane.f32.xlu0 %v376_v12 }
  0x58   : > { %543 = vadd.xlane.f32.xlu1 %v514_v23 }
  0x5a   : > { %406 = vadd.xlane.f32.xlu0 %v378_v26 }
  0x5c   : > { %547 = vadd.xlane.f32.xlu1 %v516_v28  ;;  %v2376_v28 = vld [vmem:[%s2729_s2] ss:$0 sm:$0xff] }
  0x5e   : > { %410 = vadd.xlane.f32.xlu0 %v380_v29 }
  0xad   : > { %v389_v31 = vpop.xlane.xlu1 %388 }
  0xae   : > { %v418_v36 = vmul.f32 0.0078125, %v389_v31  ;;  %v1460_v31 = vld [vmem:[%s2730_s3 + $0x328] sm:$0xff] }
  0xaf   : > { %v385_v37 = vpop.xlane.xlu0 %384 }
  0xb0   : > { %v416_v38 = vmul.f32 0.0078125, %v385_v37  ;;  %v434_v39 = vadd.f32 1e-05, %v418_v36  ;;  %v1462_v36 = vld [vmem:[%s2730_s3 + $0x338] sm:$0xff] }
  0xb1   : > { %v522_v45 = vpop.xlane.xlu1 %521 }
  0xb2   : > { %v432_v43 = vadd.f32 1e-05, %v416_v38  ;;  %1729 = vrsqrt.f32 %v434_v39  ;;  %v551_v47 = vmul.f32 0.0078125, %v522_v45  ;;  %v1593_v45 = vpack.c.bf16 %v1457_v19, %v1455_v16  ;;  %v1466_v16 = vld [vmem:[%s2730_s3 + $0x358] sm:$0xff] }
  0xb3   : > { %v518_v49 = vpop.xlane.xlu0 %517 }
  0xb4   : > { %1731 = vrsqrt.f32 %v432_v43  ;;  %v549_v50 = vmul.f32 0.0078125, %v518_v49  ;;  %v567_v53 = vadd.f32 1e-05, %v551_v47 }
  0xb5   : > { %v526_v57 = vpop.xlane.xlu1 %525 }
  0xb6   : > { %v565_v55 = vadd.f32 1e-05, %v549_v50  ;;  %1733 = vrsqrt.f32 %v567_v53  ;;  %v553_v59 = vmul.f32 0.0078125, %v526_v57  ;;  %v631_v53 = vld [vmem:[%s2730_s3 + $0x10] sm:$0xff] }
  0xb7   : > { %v393_v60 = vpop.xlane.xlu0 %392  ;;  %v1461_v57 = vld [vmem:[%s2730_s3 + $0x330] sm:$0xff] }
  0xb8   : > { %1735 = vrsqrt.f32 %v565_v55  ;;  %v420_v61 = vmul.f32 0.0078125, %v393_v60  ;;  %v569_v1 = vadd.f32 1e-05, %v553_v59  ;;  %v1595_v55 = vpack.c.bf16 %v1462_v36, %v1460_v31  ;;  %v635_v36 = vld [vmem:[%s2730_s3 + $0x30] sm:$0xff] }
  0xb9   : > { %v530_v3 = vpop.xlane.xlu1 %529 }
  0xba   : > { %v436_v2 = vadd.f32 1e-05, %v420_v61  ;;  %1737 = vrsqrt.f32 %v569_v1  ;;  %v555_v7 = vmul.f32 0.0078125, %v530_v3  ;;  %v636_v3 = vld [vmem:[%s2730_s3 + $0x38] sm:$0xff] }
  0xbb   : > { %v397_v9 = vpop.xlane.xlu0 %396 }
  0xbc   : > { %1739 = vrsqrt.f32 %v436_v2  ;;  %v422_v10 = vmul.f32 0.0078125, %v397_v9  ;;  %v1730_v12 = vpop.eup %1729  ;;  %v571_v15 = vadd.f32 1e-05, %v555_v7  ;;  %v634_v2 = vld [vmem:[%s2730_s3 + $0x28] sm:$0xff] }
  0xbd   : > { %v534_v26 = vpop.xlane.xlu1 %533  ;;  %v466_v29 = vmul.f32 %v1730_v12, %v2026_v30  ;;  %v629_v30 = vld [vmem:[%s2730_s3] sm:$0xff]  ;;  %v1531_v31 = vpack.c.bf16 %v636_v3, %v634_v2 }
  0xbe   : > { %v1732_v20 = vpop.eup %1731  ;;  %v438_v23 = vadd.f32 1e-05, %v422_v10  ;;  %1741 = vrsqrt.f32 %v571_v15  ;;  %v557_v37 = vmul.f32 0.0078125, %v534_v26  ;;  %v1464_v15 = vld [vmem:[%s2730_s3 + $0x348] sm:$0xff] }
  0xbf   : > { %v401_v38 = vpop.xlane.xlu0 %400  ;;  %v464_v39 = vmul.f32 %v1732_v20, %v2031_v34  ;;  %v1459_v34 = vld [vmem:[%s2730_s3 + $0x320] sm:$0xff]  ;;  %v488_v1 = vmul.f32 %v2376_v28, %v466_v29  ;;  %v1529_v20 = vpack.c.bf16 %v631_v53, %v629_v30  ;;  %v1599_v30 = vpack.c.bf16 %v1466_v16, %v1464_v15  ;;  %v1469_v15 = vld [vmem:[%s2730_s3 + $0x370] sm:$0xff] }
  0xc0   : > { %1743 = vrsqrt.f32 %v438_v23  ;;  %v424_v43 = vmul.f32 0.0078125, %v401_v38  ;;  %v1734_v47 = vpop.eup %1733  ;;  %v573_v49 = vadd.f32 1e-05, %v557_v37  ;;  %v1597_v23 = vpack.c.bf16 %v1461_v57, %v1459_v34  ;;  %v1463_v37 = vld [vmem:[%s2730_s3 + $0x340] sm:$0xff]  ;;  %v1465_v38 = vld [vmem:[%s2730_s3 + $0x350] sm:$0xff] }
  0xc1   : > { %v486_v50 = vmul.f32 %v2376_v28, %v464_v39  ;;  %v538_v61 = vpop.xlane.xlu1 %537  ;;  %v599_v12 = vmul.f32 %v1734_v47, %v2033_v35  ;;  %v638_v47 = vld [vmem:[%s2730_s3 + $0x48] sm:$0xff]  ;;  %v1601_v2 = vpack.c.bf16 %v1465_v38, %v1463_v37 }
  0xc2   : > { %v1736_v59 = vpop.eup %1735  ;;  %v440_v60 = vadd.f32 1e-05, %v424_v43  ;;  %1745 = vrsqrt.f32 %v573_v49  ;;  %v559_v7 = vmul.f32 0.0078125, %v538_v61  ;;  %v640_v49 = vld [vmem:[%s2730_s3 + $0x58] sm:$0xff]  ;;  %v1472_v38 = vld [vmem:[%s2730_s3 + $0x388] sm:$0xff] }
  0xc3   : > { %1018 = vmatmul.mubr.f32.vlgmr.msra.gmra.mrb[0].mxu0 %v486_v50  ;;  %v405_v9 = vpop.xlane.xlu0 %404  ;;  %v597_v10 = vmul.f32 %v1736_v59, %v2040_v40  ;;  %v633_v40 = vld [vmem:[%s2730_s3 + $0x20] sm:$0xff]  ;;  %v615_v34 = vmul.f32 %v2376_v28, %v599_v12  ;;  %v1468_v59 = vld [vmem:[%s2730_s3 + $0x368] sm:$0xff] }
  0xc4   : > { %1747 = vrsqrt.f32 %v440_v60  ;;  %v426_v19 = vmul.f32 0.0078125, %v405_v9  ;;  %1594 = vmatpush1.bf16.msra.mxu0 %v1593_v45  ;;  %1023 = vmatprep.mubr.f32.mxu0 %v1873_v24  ;;  %v1738_v35 = vpop.eup %1737  ;;  %v575_v26 = vadd.f32 1e-05, %v559_v7  ;;  %v1470_v60 = vld [vmem:[%s2730_s3 + $0x378] sm:$0xff]  ;;  %v1533_v61 = vpack.c.bf16 %v635_v36, %v633_v40  ;;  %v1467_v12 = vld [vmem:[%s2730_s3 + $0x360] sm:$0xff] }
  0xc5   : > { %v613_v29 = vmul.f32 %v2376_v28, %v597_v10  ;;  %1596 = vmatprep.subr.bf16.mxu0 %v1595_v55  ;;  %v542_v45 = vpop.xlane.xlu1 %541  ;;  %v601_v50 = vmul.f32 %v1738_v35, %v2049_v46  ;;  %v1535_v9 = vpack.c.bf16 %v640_v49, %v638_v47  ;;  %v639_v10 = vld [vmem:[%s2730_s3 + $0x50] sm:$0xff]  ;;  %v1603_v40 = vpack.c.bf16 %v1470_v60, %v1468_v59  ;;  %v642_v35 = vld [vmem:[%s2730_s3 + $0x68] sm:$0xff] }
  0xc6   : > { %v1740_v39 = vpop.eup %1739  ;;  %v442_v43 = vadd.f32 1e-05, %v426_v19  ;;  %1749 = vrsqrt.f32 %v575_v26  ;;  %v561_v53 = vmul.f32 0.0078125, %v542_v45  ;;  %v644_v26 = vld [vmem:[%s2730_s3 + $0x78] sm:$0xff] }
  0xc7   : > { %759 = vmatmul.mubr.f32.vlgmr.msra.gmra.mrb[0].mxu1 %v613_v29  ;;  %1024 = vmatmul.mubr.f32.gmra.mrb[2].mxu0 %v488_v1  ;;  %v409_v55 = vpop.xlane.xlu0 %408  ;;  %v468_v57 = vmul.f32 %v1740_v39, %v2053_v48  ;;  %v2446_v1 = vld [vmem:[%s2730_s3 + $0x40] sm:$0xff]  ;;  %v1474_v39 = vld [vmem:[%s2730_s3 + $0x398] sm:$0xff] }
  0xc8   : > { %1751 = vrsqrt.f32 %v442_v43  ;;  %1530 = vmatpush1.bf16.msra.mxu1 %v1529_v20  ;;  %v428_v46 = vmul.f32 0.0078125, %v409_v55  ;;  %1598 = vmatpush1.bf16.msra.mxu0 %v1597_v23  ;;  %v1742_v48 = vpop.eup %1741  ;;  %v577_v3 = vadd.f32 1e-05, %v561_v53  ;;  %v617_v23 = vmul.f32 %v2376_v28, %v601_v50  ;;  %v643_v53 = vld [vmem:[%s2730_s3 + $0x70] sm:$0xff]  ;;  %v1471_v55 = vld [vmem:[%s2730_s3 + $0x380] sm:$0xff] }
  0xc9   : > { %764 = vmatprep.mubr.f32.mxu1 %v1873_v24  ;;  %1532 = vmatprep.subr.bf16.mxu1 %v1531_v31  ;;  %v490_v7 = vmul.f32 %v2376_v28, %v468_v57  ;;  %v546_v20 = vpop.xlane.xlu1 %545  ;;  %v603_v37 = vmul.f32 %v1742_v48, %v2061_v54  ;;  %v1537_v45 = vpack.c.bf16 %v639_v10, %v2446_v1  ;;  %v1476_v10 = vld [vmem:[%s2730_s3 + $0x3a8] sm:$0xff] }
  0xca   : > { %v1744_v16 = vpop.eup %1743  ;;  %v444_v19 = vadd.f32 1e-05, %v428_v46  ;;  %1029 = vmatprep.mubr.f32.mxu0 %v1873_v24  ;;  %1600 = vmatprep.subr.bf16.mxu0 %v1599_v30  ;;  %1753 = vrsqrt.f32 %v577_v3  ;;  %v563_v29 = vmul.f32 0.0078125, %v546_v20  ;;  %v1605_v30 = vpack.c.bf16 %v1469_v15, %v1467_v12  ;;  %v1478_v12 = vld [vmem:[%s2730_s3 + $0x3b8] sm:$0xff] }
  0xcb   : > { %765 = vmatmul.mubr.f32.gmra.mrb[2].mxu1 %v615_v34  ;;  %1030 = vmatmul.mubr.f32.gmra.mrb[4].mxu0 %v490_v7  ;;  %v413_v31 = vpop.xlane.xlu0 %412  ;;  %v470_v36 = vmul.f32 %v1744_v16, %v2065_v56  ;;  %v641_v56 = vld [vmem:[%s2730_s3 + $0x60] sm:$0xff]  ;;  %v1539_v50 = vpack.c.bf16 %v644_v26, %v642_v35  ;;  %v1473_v34 = vld [vmem:[%s2730_s3 + $0x390] sm:$0xff]  ;;  %v1607_v46 = vpack.c.bf16 %v1474_v39, %v1472_v38 }
  0xcc   : > { %1755 = vrsqrt.f32 %v444_v19  ;;  %1534 = vmatpush1.bf16.msra.mxu1 %v1533_v61  ;;  %v430_v43 = vmul.f32 0.0078125, %v413_v31  ;;  %1602 = vmatpush1.bf16.msra.mxu0 %v1601_v2  ;;  %v1746_v54 = vpop.eup %1745  ;;  %v579_v47 = vadd.f32 1e-05, %v563_v29  ;;  %v646_v61 = vld [vmem:[%s2730_s3 + $0x88] sm:$0xff]  ;;  %v648_v2 = vld [vmem:[%s2730_s3 + $0x98] sm:$0xff]  ;;  %v619_v3 = vmul.f32 %v2376_v28, %v603_v37  ;;  %v645_v19 = vld [vmem:[%s2730_s3 + $0x80] sm:$0xff] }
  0xcd   : > { %770 = vmatprep.mubr.f32.mxu1 %v1873_v24  ;;  %1536 = vmatprep.subr.bf16.mxu1 %v1535_v9  ;;  %v492_v49 = vmul.f32 %v2376_v28, %v470_v36  ;;  %v520_v60 = vpop.xlane.xlu1 %519  ;;  %v605_v1 = vmul.f32 %v1746_v54, %v2073_v62  ;;  %v1541_v62 = vpack.c.bf16 %v643_v53, %v641_v56  ;;  %v647_v35 = vld [vmem:[%s2730_s3 + $0x90] sm:$0xff]  ;;  %v1475_v26 = vld [vmem:[%s2730_s3 + $0x3a0] sm:$0xff] }
  0xce   : > { %v1748_v57 = vpop.eup %1747  ;;  %v446_v59 = vadd.f32 1e-05, %v430_v43  ;;  %1035 = vmatprep.mubr.f32.mxu0 %v1873_v24  ;;  %1604 = vmatprep.subr.bf16.mxu0 %v1603_v40  ;;  %1757 = vrsqrt.f32 %v579_v47  ;;  %v550_v48 = vmul.f32 0.0078125, %v520_v60  ;;  %v1609_v16 = vpack.c.bf16 %v1473_v34, %v1471_v55  ;;  %v1477_v29 = vld [vmem:[%s2730_s3 + $0x3b0] sm:$0xff]  ;;  %v650_v43 = vld [vmem:[%s2730_s3 + $0xa8] sm:$0xff] }
  0xcf   : > { %771 = vmatmul.mubr.f32.gmra.mrb[4].mxu1 %v617_v23  ;;  %1036 = vmatmul.mubr.f32.gmra.mrb[6].mxu0 %v492_v49  ;;  %v472_v7 = vmul.f32 %v1748_v57, %v2077_v0  ;;  %v383_v9 = vpop.xlane.xlu0 %382  ;;  %v1543_v40 = vpack.c.bf16 %v648_v2, %v646_v61  ;;  %v621_v38 = vmul.f32 %v2376_v28, %v605_v1  ;;  %v1480_v49 = vld [vmem:[%s2730_s3 + $0x3c8] sm:$0xff]  ;;  %v1479_v61 = vld [vmem:[%s2730_s3 + $0x3c0] sm:$0xff]  ;;  %v1481_v2 = vld [vmem:[%s2730_s3 + $0x3d0] sm:$0xff] }
  0xd0   : > { %1759 = vrsqrt.f32 %v446_v59  ;;  %1538 = vmatpush1.bf16.msra.mxu1 %v1537_v45  ;;  %1606 = vmatpush1.bf16.msra.mxu0 %v1605_v30  ;;  %v415_v15 = vmul.f32 0.0078125, %v383_v9  ;;  %v1750_v0 = vpop.eup %1749  ;;  %v566_v20 = vadd.f32 1e-05, %v550_v48  ;;  %v1611_v39 = vpack.c.bf16 %v1478_v12, %v1476_v10  ;;  %v652_v45 = vld [vmem:[%s2730_s3 + $0xb8] sm:$0xff]  ;;  %v654_v9 = vld [vmem:[%s2730_s3 + $0xc8] sm:$0xff] }
  0xd1   : > { %776 = vmatprep.mubr.f32.mxu1 %v1873_v24  ;;  %1540 = vmatprep.subr.bf16.mxu1 %v1539_v50  ;;  %v494_v23 = vmul.f32 %v2376_v28, %v472_v7  ;;  %v524_v36 = vpop.xlane.xlu1 %523  ;;  %v607_v47 = vmul.f32 %v1750_v0, %v2085_v6  ;;  %v1482_v50 = vld [vmem:[%s2730_s3 + $0x3d8] sm:$0xff]  ;;  %v1545_v53 = vpack.c.bf16 %v647_v35, %v645_v19  ;;  %v1484_v0 = vld [vmem:[%s2730_s3 + $0x3e8] sm:$0xff]  ;;  %v653_v35 = vld [vmem:[%s2730_s3 + $0xc0] sm:$0xff] }
  0xd2   : > { %v1752_v31 = vpop.eup %1751  ;;  %1041 = vmatprep.mubr.f32.mxu0 %v1873_v24  ;;  %1608 = vmatprep.subr.bf16.mxu0 %v1607_v46  ;;  %v431_v37 = vadd.f32 1e-05, %v415_v15  ;;  %1761 = vrsqrt.f32 %v566_v20  ;;  %v552_v30 = vmul.f32 0.0078125, %v524_v36  ;;  %v1613_v34 = vpack.c.bf16 %v1477_v29, %v1475_v26  ;;  %v651_v46 = vld [vmem:[%s2730_s3 + $0xb0] sm:$0xff]  ;;  %v656_v10 = vld [vmem:[%s2730_s3 + $0xd8] sm:$0xff] }
  0xd3   : > { %777 = vmatmul.mubr.f32.gmra.mrb[6].mxu1 %v619_v3  ;;  %1042 = vmatmul.mubr.f32.gmra.mrb[8].mxu0 %v494_v23  ;;  %v474_v56 = vmul.f32 %v1752_v31, %v2089_v8  ;;  %v387_v54 = vpop.xlane.xlu0 %386  ;;  %v649_v8 = vld [vmem:[%s2730_s3 + $0xa0] sm:$0xff]  ;;  %v1547_v60 = vpack.c.bf16 %v652_v45, %v650_v43  ;;  %v1615_v7 = vpack.c.bf16 %v1482_v50, %v1480_v49  ;;  %v1486_v20 = vld [vmem:[%s2730_s3 + $0x3f8] sm:$0xff]  ;;  %v655_v36 = vld [vmem:[%s2730_s3 + $0xd0] sm:$0xff] }
  0xd4   : > { %1542 = vmatpush1.bf16.msra.mxu1 %v1541_v62  ;;  %1763 = vrsqrt.f32 %v431_v37  ;;  %1610 = vmatpush1.bf16.msra.mxu0 %v1609_v16  ;;  %v417_v55 = vmul.f32 0.0078125, %v387_v54  ;;  %v1754_v57 = vpop.eup %1753  ;;  %v568_v6 = vadd.f32 1e-05, %v552_v30  ;;  %v623_v15 = vmul.f32 %v2376_v28, %v607_v47  ;;  %v1483_v37 = vld [vmem:[%s2730_s3 + $0x3e0] sm:$0xff]  ;;  %v658_v54 = vld [vmem:[%s2730_s3 + $0xe8] sm:$0xff]  ;;  %v660_v47 = vld [vmem:[%s2730_s3 + $0xf8] sm:$0xff] }
  0xd5   : > { %782 = vmatprep.mubr.f32.mxu1 %v1873_v24  ;;  %1544 = vmatprep.subr.bf16.mxu1 %v1543_v40  ;;  %v496_v59 = vmul.f32 %v2376_v28, %v474_v56  ;;  %v528_v48 = vpop.xlane.xlu1 %527  ;;  %v609_v12 = vmul.f32 %v1754_v57, %v2100_v17  ;;  %v1549_v17 = vpack.c.bf16 %v651_v46, %v649_v8 }
  0xd6   : > { %v1756_v1 = vpop.eup %1755  ;;  %1047 = vmatprep.mubr.f32.mxu0 %v1873_v24  ;;  %1612 = vmatprep.subr.bf16.mxu0 %v1611_v39  ;;  %v433_v3 = vadd.f32 1e-05, %v417_v55  ;;  %1765 = vrsqrt.f32 %v568_v6  ;;  %v554_v62 = vmul.f32 0.0078125, %v528_v48  ;;  %v1617_v40 = vpack.c.bf16 %v1481_v2, %v1479_v61 }
  0xd7   : > { %783 = vmatmul.mubr.f32.gmra.mrb[8].mxu1 %v621_v38  ;;  %1048 = vmatmul.mubr.f32.gmra.mrb[10].mxu0 %v496_v59  ;;  %v476_v16 = vmul.f32 %v1756_v1, %v2111_v22  ;;  %v391_v19 = vpop.xlane.xlu0 %390  ;;  %v1551_v31 = vpack.c.bf16 %v656_v10, %v654_v9  ;;  %v1485_v38 = vld [vmem:[%s2730_s3 + $0x3f0] sm:$0xff]  ;;  %v625_v30 = vmul.f32 %v2376_v28, %v609_v12 }
  0xd8   : > { %1546 = vmatpush1.bf16.msra.mxu1 %v1545_v53  ;;  %1767 = vrsqrt.f32 %v433_v3  ;;  %1614 = vmatpush1.bf16.msra.mxu0 %v1613_v34  ;;  %v419_v23 = vmul.f32 0.0078125, %v391_v19  ;;  %v1758_v22 = vpop.eup %1757  ;;  %v570_v26 = vadd.f32 1e-05, %v554_v62  ;;  %v1619_v56 = vpack.c.bf16 %v1486_v20, %v1484_v0 }
  0xd9   : > { %788 = vmatprep.mubr.f32.mxu1 %v1873_v24  ;;  %1548 = vmatprep.subr.bf16.mxu1 %v1547_v60  ;;  %v498_v29 = vmul.f32 %v2376_v28, %v476_v16  ;;  %v532_v43 = vpop.xlane.xlu1 %531  ;;  %v611_v55 = vmul.f32 %v1758_v22, %v2131_v32  ;;  %v1553_v34 = vpack.c.bf16 %v655_v36, %v653_v35  ;;  %v659_v32 = vld [vmem:[%s2730_s3 + $0xf0] sm:$0xff] }
  0xda   : > { %v1760_v39 = vpop.eup %1759  ;;  %1053 = vmatprep.mubr.f32.mxu0 %v1873_v24  ;;  %1616 = vmatprep.subr.bf16.mxu0 %v1615_v7  ;;  %v435_v45 = vadd.f32 1e-05, %v419_v23  ;;  %1769 = vrsqrt.f32 %v570_v26  ;;  %v556_v49 = vmul.f32 0.0078125, %v532_v43  ;;  %v1621_v57 = vpack.c.bf16 %v1485_v38, %v1483_v37 }
  0xdb   : > { %789 = vmatmul.mubr.f32.gmra.mrb[10].mxu1 %v623_v15  ;;  %1054 = vmatmul.mubr.f32.gmra.mrb[12].mxu0 %v498_v29  ;;  %v478_v50 = vmul.f32 %v1760_v39, %v2146_v44  ;;  %v395_v53 = vpop.xlane.xlu0 %394  ;;  %v1555_v46 = vpack.c.bf16 %v660_v47, %v658_v54  ;;  %v657_v44 = vld [vmem:[%s2730_s3 + $0xe0] sm:$0xff]  ;;  %v627_v9 = vmul.f32 %v2376_v28, %v611_v55 }
  0xdc   : > { %1550 = vmatpush1.bf16.msra.mxu1 %v1549_v17  ;;  %1771 = vrsqrt.f32 %v435_v45  ;;  %1618 = vmatpush1.bf16.msra.mxu0 %v1617_v40  ;;  %v421_v8 = vmul.f32 0.0078125, %v395_v53  ;;  %v1762_v6 = vpop.eup %1761  ;;  %v572_v59 = vadd.f32 1e-05, %v556_v49  ;;  %v1557_v12 = vpack.c.bf16 %v659_v32, %v657_v44 }
  0xdd   : > { %794 = vmatprep.mubr.f32.mxu1 %v1873_v24  ;;  %1552 = vmatprep.subr.bf16.mxu1 %v1551_v31  ;;  %v500_v60 = vmul.f32 %v2376_v28, %v478_v50  ;;  %v598_v2 = vmul.f32 %v1762_v6, %v2194_v14  ;;  %v536_v1 = vpop.xlane.xlu1 %535 }
  0xde   : > { %v1764_v61 = vpop.eup %1763  ;;  %1059 = vmatprep.mubr.f32.mxu0 %v1873_v24  ;;  %1620 = vmatprep.subr.bf16.mxu0 %v1619_v56  ;;  %v437_v48 = vadd.f32 1e-05, %v421_v8  ;;  %1773 = vrsqrt.f32 %v572_v59  ;;  %v558_v7 = vmul.f32 0.0078125, %v536_v1 }
  0xdf   : > { %v463_v3 = vmul.f32 %v1764_v61, %v2207_v21  ;;  %795 = vmatmul.mubr.f32.gmra.mrb[12].mxu1 %v625_v30  ;;  %1060 = vmatmul.mubr.f32.gmra.mrb[14].mxu0 %v500_v60  ;;  %v399_v10 = vpop.xlane.xlu0 %398  ;;  %v614_v14 = vmul.f32 %v2376_v28, %v598_v2 }
  0xe0   : > { %1554 = vmatpush1.bf16.msra.mxu1 %v1553_v34  ;;  %1775 = vrsqrt.f32 %v437_v48  ;;  %1622 = vmatpush1.bf16.msra.mxu0 %v1621_v57  ;;  %v423_v62 = vmul.f32 0.0078125, %v399_v10  ;;  %v1766_v15 = vpop.eup %1765  ;;  %v574_v16 = vadd.f32 1e-05, %v558_v7 }
  0xe1   : > { %800 = vmatprep.mubr.f32.mxu1 %v1873_v24  ;;  %1556 = vmatprep.subr.bf16.mxu1 %v1555_v46  ;;  %v540_v19 = vpop.xlane.xlu1 %539  ;;  %v600_v20 = vmul.f32 %v1766_v15, %v2234_v42  ;;  %v485_v23 = vmul.f32 %v2376_v28, %v463_v3 }
  0xe2   : > { %v1768_v21 = vpop.eup %1767  ;;  %1179 = vmatprep.mubr.f32.mxu0 %v1873_v24  ;;  %v439_v0 = vadd.f32 1e-05, %v423_v62  ;;  %1777 = vrsqrt.f32 %v574_v16  ;;  %v560_v17 = vmul.f32 0.0078125, %v540_v19 }
  0xe3   : > { %801 = vmatmul.mubr.f32.gmra.mrb[14].mxu1 %v627_v9  ;;  %1180 = vmatmul.mubr.f32.vlgmr.msra.gmra.mrb[0].mxu0 %v614_v14  ;;  %v403_v40 = vpop.xlane.xlu0 %402  ;;  %v465_v35 = vmul.f32 %v1768_v21, %v2247_v51  ;;  %v616_v22 = vmul.f32 %v2376_v28, %v600_v20 }
  0xe4   : > { %1558 = vmatpush1.bf16.msra.mxu1 %v1557_v12  ;;  %1779 = vrsqrt.f32 %v439_v0  ;;  %871 = vmatprep.mubr.f32.mxu1 %v1873_v24  ;;  %v425_v26 = vmul.f32 0.0078125, %v403_v40  ;;  %v1770_v29 = vpop.eup %1769  ;;  %v576_v31 = vadd.f32 1e-05, %v560_v17 }
  0xe5   : > { %1185 = vmatprep.mubr.f32.mxu0 %v1873_v24  ;;  %v544_v36 = vpop.xlane.xlu1 %543  ;;  %v602_v38 = vmul.f32 %v1770_v29, %v2272_v5  ;;  %v487_v51 = vmul.f32 %v2376_v28, %v465_v35 }
  0xe6   : > { %v1772_v42 = vpop.eup %1771  ;;  %v441_v37 = vadd.f32 1e-05, %v425_v26  ;;  %1781 = vrsqrt.f32 %v576_v31  ;;  %v562_v39 = vmul.f32 0.0078125, %v544_v36 }
  0xe7   : > { %872 = vmatmul.mubr.f32.vlgmr.msra.gmra.mrb[0].mxu1 %v485_v23  ;;  %1186 = vmatmul.mubr.f32.gmra.mrb[2].mxu0 %v616_v22  ;;  %v407_v43 = vpop.xlane.xlu0 %406  ;;  %v467_v45 = vmul.f32 %v1772_v42, %v2283_v13  ;;  %v618_v30 = vmul.f32 %v2376_v28, %v602_v38 }
  0xe8   : > { %1783 = vrsqrt.f32 %v441_v37  ;;  %877 = vmatprep.mubr.f32.mxu1 %v1873_v24  ;;  %1191 = vmatprep.mubr.f32.mxu0 %v1873_v24  ;;  %v427_v56 = vmul.f32 0.0078125, %v407_v43  ;;  %v1774_v54 = vpop.eup %1773  ;;  %v578_v47 = vadd.f32 1e-05, %v562_v39 }
  0xe9   : > { %v548_v49 = vpop.xlane.xlu1 %547  ;;  %v604_v53 = vmul.f32 %v1774_v54, %v2309_v33  ;;  %v489_v13 = vmul.f32 %v2376_v28, %v467_v45 }
  0xea   : > { %v1776_v5 = vpop.eup %1775  ;;  %v443_v50 = vadd.f32 1e-05, %v427_v56  ;;  %1785 = vrsqrt.f32 %v578_v47  ;;  %v564_v55 = vmul.f32 0.0078125, %v548_v49 }
  0xeb   : > { %878 = vmatmul.mubr.f32.gmra.mrb[2].mxu1 %v487_v51  ;;  %1192 = vmatmul.mubr.f32.gmra.mrb[4].mxu0 %v618_v30  ;;  %v411_v34 = vpop.xlane.xlu0 %410  ;;  %v469_v8 = vmul.f32 %v1776_v5, %v2315_v41  ;;  %v620_v57 = vmul.f32 %v2376_v28, %v604_v53 }
  0xec   : > { %1787 = vrsqrt.f32 %v443_v50  ;;  %883 = vmatprep.mubr.f32.mxu1 %v1873_v24  ;;  %1197 = vmatprep.mubr.f32.mxu0 %v1873_v24  ;;  %v429_v6 = vmul.f32 0.0078125, %v411_v34  ;;  %v1778_v59 = vpop.eup %1777  ;;  %v580_v60 = vadd.f32 1e-05, %v564_v55 }
  0xed   : > { %v606_v44 = vmul.f32 %v1778_v59, %v2321_v52  ;;  %v491_v32 = vmul.f32 %v2376_v28, %v469_v8 }
  0xee   : > { %v1780_v33 = vpop.eup %1779  ;;  %v445_v46 = vadd.f32 1e-05, %v429_v6  ;;  %1789 = vrsqrt.f32 %v580_v60 }
  0xef   : > { %884 = vmatmul.mubr.f32.gmra.mrb[4].mxu1 %v489_v13  ;;  %1198 = vmatmul.mubr.f32.gmra.mrb[6].mxu0 %v620_v57  ;;  %v471_v41 = vmul.f32 %v1780_v33, %v2327_v58  ;;  %v622_v61 = vmul.f32 %v2376_v28, %v606_v44 }
  0xf0   : > { %1791 = vrsqrt.f32 %v445_v46  ;;  %889 = vmatprep.mubr.f32.mxu1 %v1873_v24  ;;  %1203 = vmatprep.mubr.f32.mxu0 %v1873_v24  ;;  %v1782_v2 = vpop.eup %1781 }
  0xf1   : > { %v608_v48 = vmul.f32 %v1782_v2, %v2333_v63  ;;  %v493_v52 = vmul.f32 %v2376_v28, %v471_v41 }
  0xf2   : > { %v1784_v1 = vpop.eup %1783 }
  0xf3   : > { %890 = vmatmul.mubr.f32.gmra.mrb[6].mxu1 %v491_v32  ;;  %1204 = vmatmul.mubr.f32.gmra.mrb[8].mxu0 %v622_v61  ;;  %v473_v3 = vmul.f32 %v1784_v1, %v2339_v4  ;;  %v624_v58 = vmul.f32 %v2376_v28, %v608_v48 }
  0xf4   : > { %895 = vmatprep.mubr.f32.mxu1 %v1873_v24  ;;  %1209 = vmatprep.mubr.f32.mxu0 %v1873_v24  ;;  %v1786_v7 = vpop.eup %1785 }
  0xf5   : > { %v610_v10 = vmul.f32 %v1786_v7, %v2345_v11  ;;  %v495_v63 = vmul.f32 %v2376_v28, %v473_v3 }
  0xf6   : > { %v1788_v9 = vpop.eup %1787 }
  0xf7   : > { %896 = vmatmul.mubr.f32.gmra.mrb[8].mxu1 %v493_v52  ;;  %1210 = vmatmul.mubr.f32.gmra.mrb[10].mxu0 %v624_v58  ;;  %v475_v12 = vmul.f32 %v1788_v9, %v2351_v18  ;;  %v626_v4 = vmul.f32 %v2376_v28, %v610_v10 }
  0xf8   : > { %901 = vmatprep.mubr.f32.mxu1 %v1873_v24  ;;  %1215 = vmatprep.mubr.f32.mxu0 %v1873_v24  ;;  %v1790_v14 = vpop.eup %1789 }
  0xf9   : > { %v612_v15 = vmul.f32 %v1790_v14, %v2357_v25  ;;  %v497_v11 = vmul.f32 %v2376_v28, %v475_v12 }
  0xfa   : > { %v1792_v62 = vpop.eup %1791 }
  0xfb   : > { %902 = vmatmul.mubr.f32.gmra.mrb[10].mxu1 %v495_v63  ;;  %1216 = vmatmul.mubr.f32.gmra.mrb[12].mxu0 %v626_v4  ;;  %v477_v16 = vmul.f32 %v1792_v62, %v2361_v27  ;;  %v628_v18 = vmul.f32 %v2376_v28, %v612_v15 }
  0xfc   : > { %907 = vmatprep.mubr.f32.mxu1 %v1873_v24  ;;  %1221 = vmatprep.mubr.f32.mxu0 %v1873_v24 }
  0xfd   : > { %v499_v21 = vmul.f32 %v2376_v28, %v477_v16 }
  0xff   : > { %908 = vmatmul.mubr.f32.gmra.mrb[12].mxu1 %v497_v11  ;;  %1222 = vmatmul.mubr.f32.gmra.mrb[14].mxu0 %v628_v18 }
 0x100   : > { %913 = vmatprep.mubr.f32.mxu1 %v1873_v24 }
 0x103   : > { %914 = vmatmul.mubr.f32.gmra.mrb[14].mxu1 %v499_v21 }
 0x1b6   : > { %v1181_v25 = vpop.f32.mrb[0].mxu0 }
 0x1b7   : > { %v1183_v19 = vpop.f32.mrb[1].mxu0 }
 0x1ba   : > { %v873_v0 = vpop.f32.mrb[0].mxu1  ;;  %v1187_v27 = vpop.f32.mrb[2].mxu0 }
 0x1bb   : > { %v1623_v20 = vadd.f32 %v1181_v25, %v873_v0  ;;  %v875_v17 = vpop.f32.mrb[1].mxu1  ;;  %v1189_v23 = vpop.f32.mrb[3].mxu0 }
 0x1bc   : > { %v1624_v40 = vadd.f32 %v1183_v19, %v875_v17 }
 0x1bd   : > { %1244 = vst [vmem:[%s2652_s14] sm:$0xff] %v1623_v20 }
 0x1be   : > { %1245 = vst [vmem:[%s2652_s14 + $0x8] sm:$0xff] %v1624_v40  ;;  %v879_v24 = vpop.f32.mrb[2].mxu1  ;;  %v1193_v28 = vpop.f32.mrb[4].mxu0 }
 0x1bf   : > { %v1625_v35 = vadd.f32 %v1187_v27, %v879_v24  ;;  %v881_v22 = vpop.f32.mrb[3].mxu1  ;;  %v1195_v26 = vpop.f32.mrb[5].mxu0 }
 0x1c0   : > { %v1626_v29 = vadd.f32 %v1189_v23, %v881_v22 }
 0x1c1   : > { %1246 = vst [vmem:[%s2652_s14 + $0x10] sm:$0xff] %v1625_v35 }
 0x1c2   : > { %1247 = vst [vmem:[%s2652_s14 + $0x18] sm:$0xff] %v1626_v29  ;;  %v885_v31 = vpop.f32.mrb[4].mxu1  ;;  %v1199_v42 = vpop.f32.mrb[6].mxu0 }
 0x1c3   : > { %v1627_v36 = vadd.f32 %v1193_v28, %v885_v31  ;;  %v887_v37 = vpop.f32.mrb[5].mxu1  ;;  %v1201_v38 = vpop.f32.mrb[7].mxu0 }
 0x1c4   : > { %v1628_v39 = vadd.f32 %v1195_v26, %v887_v37 }
 0x1c5   : > { %1248 = vst [vmem:[%s2652_s14 + $0x20] sm:$0xff] %v1627_v36 }
 0x1c6   : > { %1249 = vst [vmem:[%s2652_s14 + $0x28] sm:$0xff] %v1628_v39  ;;  %v891_v51 = vpop.f32.mrb[6].mxu1  ;;  %v1205_v43 = vpop.f32.mrb[8].mxu0 }
 0x1c7   : > { %v1629_v45 = vadd.f32 %v1199_v42, %v891_v51  ;;  %v893_v30 = vpop.f32.mrb[7].mxu1  ;;  %v1207_v56 = vpop.f32.mrb[9].mxu0 }
 0x1c8   : > { %v1630_v54 = vadd.f32 %v1201_v38, %v893_v30 }
 0x1c9   : > { %1250 = vst [vmem:[%s2652_s14 + $0x30] sm:$0xff] %v1629_v45 }
 0x1ca   : > { %1251 = vst [vmem:[%s2652_s14 + $0x38] sm:$0xff] %v1630_v54  ;;  %v897_v47 = vpop.f32.mrb[8].mxu1  ;;  %v1211_v5 = vpop.f32.mrb[10].mxu0 }
 0x1cb   : > { %v1631_v49 = vadd.f32 %v1205_v43, %v897_v47  ;;  %v899_v50 = vpop.f32.mrb[9].mxu1  ;;  %v1213_v53 = vpop.f32.mrb[11].mxu0 }
 0x1cc   : > { %v1632_v55 = vadd.f32 %v1207_v56, %v899_v50 }
 0x1cd   : > { %1252 = vst [vmem:[%s2652_s14 + $0x40] sm:$0xff] %v1631_v49 }
 0x1ce   : > { %1253 = vst [vmem:[%s2652_s14 + $0x48] sm:$0xff] %v1632_v55  ;;  %v903_v13 = vpop.f32.mrb[10].mxu1  ;;  %v1217_v34 = vpop.f32.mrb[12].mxu0 }
 0x1cf   : > { %v1633_v8 = vadd.f32 %v1211_v5, %v903_v13  ;;  %v905_v57 = vpop.f32.mrb[11].mxu1  ;;  %v1219_v6 = vpop.f32.mrb[13].mxu0 }
 0x1d0   : > { %v1634_v59 = vadd.f32 %v1213_v53, %v905_v57 }
 0x1d1   : > { %1254 = vst [vmem:[%s2652_s14 + $0x50] sm:$0xff] %v1633_v8 }
 0x1d2   : > { %1255 = vst [vmem:[%s2652_s14 + $0x58] sm:$0xff] %v1634_v59  ;;  %v909_v60 = vpop.f32.mrb[12].mxu1  ;;  %v1223_v33 = vpop.f32.mrb[14].mxu0 }
 0x1d3   : > { %v1635_v46 = vadd.f32 %v1217_v34, %v909_v60  ;;  %v911_v44 = vpop.f32.mrb[13].mxu1  ;;  %v1225_v32 = vpop.f32.mrb[15].mxu0 }
 0x1d4   : > { %v1636_v41 = vadd.f32 %v1219_v6, %v911_v44 }
 0x1d5   : > { %1256 = vst [vmem:[%s2652_s14 + $0x60] sm:$0xff] %v1635_v46 }
 0x1d6   : > { %1257 = vst [vmem:[%s2652_s14 + $0x68] sm:$0xff] %v1636_v41  ;;  %v915_v61 = vpop.f32.mrb[14].mxu1 }
 0x1d7   : > { %v1637_v2 = vadd.f32 %v1223_v33, %v915_v61  ;;  %v917_v1 = vpop.f32.mrb[15].mxu1 }
 0x1d8   : > { %v1638_v48 = vadd.f32 %v1225_v32, %v917_v1 }
 0x1d9   : > { %1258 = vst [vmem:[%s2652_s14 + $0x70] sm:$0xff] %v1637_v2 }
 0x1da   : > { %1259 = vst [vmem:[%s2652_s14 + $0x78] sm:$0xff] %v1638_v48 }
 0x1db   : > { %1806 = shalt.err (!%p1803_p5)
}
 0x1dc   : > { %s1807_s6 = scalar_lea.hbm %s2673_s8, 2048  ;;  %s1811_s10 = scalar_lea.hbm %s2731_s4, 4096 }
 0x1dd   : > { %p1808_p6 = scmp.ne.s32.totalorder %s2673_s8, %s1807_s6  ;;  %p1812_p10 = scmp.lt.u32.totalorder %s2673_s8, %s2731_s4 }
 0x1de   : > { %p1813_p11 = scmp.lt.u32.totalorder %s1811_s10, %s1807_s6  ;;  %p1815_p13 = scmp.lt.u32.totalorder %s1807_s6, %s2673_s8 }
 0x1df   : > { %p1809_p7 = pnand %p1808_p6, %p1942_p4 }
 0x1e0   : > { %p1814_p12 = por %p1813_p11, %p1812_p10 }
 0x1e1   : > { %p1810_p9 = pneg %p1809_p7 }
 0x1e2   : > { %p1816_p0 = por %p1815_p13, %p1814_p12 }
 0x1e4   : > { %p1817_p1 = pnand %p1816_p0, %p1810_p9 }
 0x1e6   : > { %1820 = shalt.err (!%p1817_p1)
}
 0x1e7   : > { %s1875_s14 = smov 256   ;;  %s1876_s22 = smov 16  }
 0x1e8   : > { %1671 = dma.vmem_to_hbm [thread:$0]  (%p1942_p4), %s2675_s12, 2048, %s2673_s8, %s2681_s18, %s1875_s14, %s1875_s14, %s1876_s22  }
 0x1e9 PF: > { %p1677_p2 = scmp.ge.s32.totalorder %s1871_s20, 2  ;;  %s1292_s24 = sand.u32 1, %s1851_s15  }
 0x1ea   : > { %s1293_s21 = scalar_lea.sflag [#allocation3], %s1292_s24 }
 0x1eb   : > { %p1674_p3 = pnand %p1677_p2, %p1949_p8 }
 0x1ed   : > { %1846 = dma.done.wait (!%p1674_p3), %s1293_s21, 2048  }
 0x1ee   : > { %1848 = vsyncadd (!%p1674_p3), %s1293_s21, 4294965248  ;;  %s17_s20 = sadd.s32 1, %s1871_s20   ;;  %s2734_s15 = smov %s1855_s16 }
 0x1ef   : > { %p14_p5 = scmp.ge.s32.totalorder %s17_s20, 4   ;;  %s2735_s16 = smov %s1859_s17 }
 0x1f0   : > { %s2736_s17 = smov %s1955_s28  ;;  %s2737_s18 = smov %s1867_s19 }
 0x1f1   : > { %s2738_s19 = smov %s2740_s23  ;;  %16 = sbr.rel (!%p14_p5) target bundleno = 4 (0x4), region = 77 }
 0x1f8   :  { %1298 = vsyncpa [#allocation3], 1 }
 0x1f9   :  { %1300 = vsyncpa [#allocation3 + $0x1], 1 }

</bundles_post_ra>
